<compile_context>
chip_gen: v5e
topology: v5e:2x2
jax: 0.10.0
libtpu: 0.0.40
codegen_flags: <defaults>
</compile_context>

<pallas_src>
import math
import functools

import jax
import jax.numpy as jnp
from jax.experimental import pallas as pl
from jax.experimental.pallas import tpu as pltpu


# ---------------------------------------------------------------------------
# Kernel: fused projection head for one batch tile.
#   relu(x @ W1 + b1) @ W2 + b2
# W1, W2 are bf16 (resident MXU operands); x is cast to bf16 in-kernel;
# MXU accumulation, bias adds and ReLU are f32; hidden activation is bf16.
# ---------------------------------------------------------------------------
def _proj_head_kernel(x_ref, w1_ref, b1_ref, w2_ref, b2_ref, o_ref):
    # In-kernel activation downcast (no separate HBM cast pass in the wrapper).
    x = x_ref[...].astype(jnp.bfloat16)                       # (tile_b, 512)

    # Linear 1: bf16 x bf16 -> f32 accumulate on the MXU.
    h = jnp.dot(x, w1_ref[...], preferred_element_type=jnp.float32)

    # Fused bias + ReLU + downcast: never materialize a second f32 copy of h.
    h = jnp.maximum(h + b1_ref[...], 0.0).astype(jnp.bfloat16)

    # Linear 2: bf16 x bf16 -> f32 accumulate, f32 bias, lane-dense 256-wide store.
    out = jnp.dot(h, w2_ref[...], preferred_element_type=jnp.float32)
    o_ref[...] = (out + b2_ref[...]).astype(o_ref.dtype)


def _round_up(n, m):
    return ((n + m - 1) // m) * m


def _choose_tile_b(B, block_b):
    """Batch tile: 8-sublane aligned, <= block_b, >= 2 grid steps when B >= 256."""
    if B < 256:
        return _round_up(B, 8)                 # single (possibly ragged) tile
    tile = _round_up(pl.cdiv(B, 2), 128)       # >= 2 steps -> both v7x TCs get work
    return min(block_b, tile)


@functools.partial(jax.jit, static_argnames=("block_b",))
def mri_encoder_forward(x_emb, params, block_b=512):
    """MRIEncoder.forward, minus the resnet10 3-D backbone.

    x_emb:  (B, 512) float32 embeddings (stand-in for self.encoder(x) output).
    params: (w1 bf16 (512,512), b1 f32 (1,512), w2 bf16 (512,256), b2 f32 (1,256))
            as produced by prepare_params().
    Returns (projection, embedding) exactly like the PyTorch module.
    """
    w1, b1, w2, b2 = params
    B, d_in = x_emb.shape
    hidden = w1.shape[1]
    n_out = w2.shape[1]

    tile_b = _choose_tile_b(B, block_b)
    grid = (pl.cdiv(B, tile_b),)               # ragged last block handled by masking

    proj = pl.pallas_call(
        _proj_head_kernel,
        out_shape=jax.ShapeDtypeStruct((B, n_out), jnp.float32),
        grid_spec=pltpu.PrefetchScalarGridSpec(
            num_scalar_prefetch=0,
            grid=grid,
            in_specs=[
                pl.BlockSpec((tile_b, d_in), lambda i: (i, 0)),   # x batch tile (f32)
                pl.BlockSpec((d_in, hidden), lambda i: (0, 0)),   # W1 resident (bf16)
                pl.BlockSpec((1, hidden), lambda i: (0, 0)),      # b1 (f32)
                pl.BlockSpec((hidden, n_out), lambda i: (0, 0)),  # W2 resident (bf16)
                pl.BlockSpec((1, n_out), lambda i: (0, 0)),       # b2 (f32)
            ],
            out_specs=pl.BlockSpec((tile_b, n_out), lambda i: (i, 0)),
        ),
        compiler_params=pltpu.CompilerParams(
            dimension_semantics=("parallel",),   # batch tiles shard across TCs (v7x)
        ),
    )(x_emb, w1, b1, w2, b2)

    return proj, x_emb


# ---------------------------------------------------------------------------
# Parameter init (PyTorch default Linear init), weights stored (in, out).
# ---------------------------------------------------------------------------
def init_params(key, embedding_dim=512):
    hidden = embedding_dim              # Linear(embedding_dim, embedding_dim)
    n_out = embedding_dim // 2          # Linear(embedding_dim, embedding_dim/2)
    k1, k2, k3, k4 = jax.random.split(key, 4)
    lim1 = 1.0 / math.sqrt(embedding_dim)
    lim2 = 1.0 / math.sqrt(hidden)
    w1 = jax.random.uniform(k1, (embedding_dim, hidden), jnp.float32, -lim1, lim1)
    b1 = jax.random.uniform(k2, (1, hidden), jnp.float32, -lim1, lim1)
    w2 = jax.random.uniform(k3, (hidden, n_out), jnp.float32, -lim2, lim2)
    b2 = jax.random.uniform(k4, (1, n_out), jnp.float32, -lim2, lim2)
    return w1, b1, w2, b2


def prepare_params(params_f32):
    """One-time cast: bf16 MXU weights, f32 biases. Store and reuse across calls."""
    w1, b1, w2, b2 = params_f32
    return (w1.astype(jnp.bfloat16), b1.astype(jnp.float32),
            w2.astype(jnp.bfloat16), b2.astype(jnp.float32))


def _reference(x, w1, b1, w2, b2):
    h = jnp.maximum(x @ w1 + b1, 0.0)
    return h @ w2 + b2


if __name__ == "__main__":
    key = jax.random.PRNGKey(0)
    kx, kx2, kp = jax.random.split(key, 3)

    embedding_dim = 512   # fixed by the module (resnet10 feature width / Linear(512, ...))
    params_f32 = init_params(kp, embedding_dim=embedding_dim)
    params = prepare_params(params_f32)     # bf16 weights cast once, reused every call

    # --- small / ragged batch (grid = 1, ragged block masked, no padding copies) ---
    batch = 10
    x_emb = jax.random.normal(kx, (batch, embedding_dim), jnp.float32)
    proj, emb = mri_encoder_forward(x_emb, params)
    proj = jax.block_until_ready(proj)

    ref = _reference(x_emb, *params_f32)
    assert proj.shape == (batch, embedding_dim // 2), proj.shape
    assert emb.shape == (batch, embedding_dim), emb.shape
    assert jnp.allclose(emb, x_emb)
    err = float(jnp.max(jnp.abs(proj - ref)))
    assert err < 1e-1, f"max abs err {err}"

    # --- larger batch: >= 2 parallel grid steps, ragged last tile, no pad/slice ---
    batch2 = 640
    x_emb2 = jax.random.normal(kx2, (batch2, embedding_dim), jnp.float32)
    proj2, _ = mri_encoder_forward(x_emb2, params)
    proj2 = jax.block_until_ready(proj2)
    ref2 = _reference(x_emb2, *params_f32)
    err2 = float(jnp.max(jnp.abs(proj2 - ref2)))
    assert proj2.shape == (batch2, embedding_dim // 2), proj2.shape
    assert err2 < 1e-1, f"max abs err {err2}"

    print("KERNEL_OK")
</pallas_src>

<mosaic_0001>
module attributes {stable_mosaic.version = 11 : i64} {
  func.func @_proj_head_kernel(%arg0: i32, %arg1: memref<16x512xf32, #tpu.memory_space<vmem>>, %arg2: memref<512x512xbf16, #tpu.memory_space<vmem>>, %arg3: memref<1x512xf32, #tpu.memory_space<vmem>>, %arg4: memref<512x256xbf16, #tpu.memory_space<vmem>>, %arg5: memref<1x256xf32, #tpu.memory_space<vmem>>, %arg6: memref<16x256xf32, #tpu.memory_space<vmem>>) attributes {dimension_semantics = [#tpu.dimension_semantics<parallel>], iteration_bounds = array<i64: 1>, scalar_prefetch = 0 : i64, scratch_operands = 0 : i64, tpu.core_type = #tpu.core_type<tc>, window_params = [{transform_indices = @transform_0, window_bounds = array<i64: 16, 512>}, {pipeline_mode = #tpu.pipeline_mode<synchronous>, transform_indices = @transform_1, window_bounds = array<i64: 512, 512>}, {pipeline_mode = #tpu.pipeline_mode<synchronous>, transform_indices = @transform_2, window_bounds = array<i64: 1, 512>}, {pipeline_mode = #tpu.pipeline_mode<synchronous>, transform_indices = @transform_3, window_bounds = array<i64: 512, 256>}, {pipeline_mode = #tpu.pipeline_mode<synchronous>, transform_indices = @transform_4, window_bounds = array<i64: 1, 256>}, {transform_indices = @transform_5, window_bounds = array<i64: 16, 256>}]} {
    %c0 = arith.constant 0 : index
    %c0_0 = arith.constant 0 : index
    %0 = vector.load %arg1[%c0, %c0_0] : memref<16x512xf32, #tpu.memory_space<vmem>>, vector<16x512xf32>
    %1 = arith.truncf %0 : vector<16x512xf32> to vector<16x512xbf16>
    %c0_1 = arith.constant 0 : index
    %c0_2 = arith.constant 0 : index
    %2 = vector.load %arg2[%c0_1, %c0_2] : memref<512x512xbf16, #tpu.memory_space<vmem>>, vector<512x512xbf16>
    %cst = arith.constant dense<0.000000e+00> : vector<16x512xf32>
    %3 = tpu.matmul %1, %2, %cst {dimension_numbers = #tpu.dot_dimension_numbers<[1], [0], [0], [1], [0, 0, 1, 1], [], []>} : vector<16x512xbf16>, vector<512x512xbf16>, vector<16x512xf32> -> vector<16x512xf32>
    %c0_3 = arith.constant 0 : index
    %c0_4 = arith.constant 0 : index
    %4 = vector.load %arg3[%c0_3, %c0_4] : memref<1x512xf32, #tpu.memory_space<vmem>>, vector<1x512xf32>
    %5 = vector.broadcast %4 : vector<1x512xf32> to vector<16x512xf32>
    %6 = arith.addf %3, %5 : vector<16x512xf32>
    %cst_5 = arith.constant 0.000000e+00 : f32
    %7 = vector.broadcast %cst_5 : f32 to vector<16x512xf32>
    %8 = arith.maximumf %6, %7 : vector<16x512xf32>
    %9 = arith.truncf %8 : vector<16x512xf32> to vector<16x512xbf16>
    %c0_6 = arith.constant 0 : index
    %c0_7 = arith.constant 0 : index
    %10 = vector.load %arg4[%c0_6, %c0_7] : memref<512x256xbf16, #tpu.memory_space<vmem>>, vector<512x256xbf16>
    %cst_8 = arith.constant dense<0.000000e+00> : vector<16x256xf32>
    %11 = tpu.matmul %9, %10, %cst_8 {dimension_numbers = #tpu.dot_dimension_numbers<[1], [0], [0], [1], [0, 0, 1, 1], [], []>} : vector<16x512xbf16>, vector<512x256xbf16>, vector<16x256xf32> -> vector<16x256xf32>
    %c0_9 = arith.constant 0 : index
    %c0_10 = arith.constant 0 : index
    %12 = vector.load %arg5[%c0_9, %c0_10] : memref<1x256xf32, #tpu.memory_space<vmem>>, vector<1x256xf32>
    %13 = vector.broadcast %12 : vector<1x256xf32> to vector<16x256xf32>
    %14 = arith.addf %11, %13 : vector<16x256xf32>
    %c0_11 = arith.constant 0 : index
    %c0_12 = arith.constant 0 : index
    %15 = vector.load %arg6[%c0_11, %c0_12] : memref<16x256xf32, #tpu.memory_space<vmem>>, vector<16x256xf32>
    tpu.vector_store %arg6[%c0_11, %c0_12], %14 {strides = array<i32>} : memref<16x256xf32, #tpu.memory_space<vmem>>, vector<16x256xf32>,
    return
  }
  func.func @transform_0(%arg0: i32) -> (i32, i32) {
    %c0_i32 = arith.constant 0 : i32
    %c0_i32_0 = arith.constant 0 : i32
    return %arg0, %c0_i32 : i32, i32
  }
  func.func @transform_1(%arg0: i32) -> (i32, i32) {
    %c0_i32 = arith.constant 0 : i32
    %c0_i32_0 = arith.constant 0 : i32
    %c0_i32_1 = arith.constant 0 : i32
    return %c0_i32, %c0_i32_0 : i32, i32
  }
  func.func @transform_2(%arg0: i32) -> (i32, i32) {
    %c0_i32 = arith.constant 0 : i32
    %c0_i32_0 = arith.constant 0 : i32
    %c0_i32_1 = arith.constant 0 : i32
    return %c0_i32, %c0_i32_0 : i32, i32
  }
  func.func @transform_3(%arg0: i32) -> (i32, i32) {
    %c0_i32 = arith.constant 0 : i32
    %c0_i32_0 = arith.constant 0 : i32
    %c0_i32_1 = arith.constant 0 : i32
    return %c0_i32, %c0_i32_0 : i32, i32
  }
  func.func @transform_4(%arg0: i32) -> (i32, i32) {
    %c0_i32 = arith.constant 0 : i32
    %c0_i32_0 = arith.constant 0 : i32
    %c0_i32_1 = arith.constant 0 : i32
    return %c0_i32, %c0_i32_0 : i32, i32
  }
  func.func @transform_5(%arg0: i32) -> (i32, i32) {
    %c0_i32 = arith.constant 0 : i32
    %c0_i32_0 = arith.constant 0 : i32
    return %arg0, %c0_i32 : i32, i32
  }
}

</mosaic_0001>

<bundles_post_ra>
// kernel: mri_encoder_forward.1
= control target key start
LH: loop header
LB: loop body
LE: loop exit
PB: predicated region body
PF: predicated region fallthrough
CT: control target
= control target key end

     0   :  { %10 = vsyncpa [#allocation3], 0  ;;  %s2829_s0 = inlined_call_operand.hbm [shape: f32[10,512], index: 0, kind: input, shape index: {}]   ;;  %s2830_s1 = inlined_call_operand.hbm [shape: bf16[512,512], index: 1, kind: input, shape index: {}]   ;;  %s2831_s2 = inlined_call_operand.hbm [shape: f32[1,512], index: 2, kind: input, shape index: {}]   ;;  %s2832_s3 = inlined_call_operand.hbm [shape: bf16[512,256], index: 3, kind: input, shape index: {}]   ;;  %s2833_s4 = inlined_call_operand.vmem [shape: f32[1,256], index: 4, kind: input, shape index: {}]   ;;  %s2834_s5 = inlined_call_operand.hbm [shape: f32[10,256], index: 5, kind: output, shape index: {}]  }
   0x1   :  { %11 = vsyncpa [#allocation6], 0 }
   0x2   :  { %12 = vsyncpa [#allocation9], 0  ;;  %s31_s20 = sshll.u32 %s2830_s1, 4  ;;  %s32_s20 = int_to_ptr.hbm [resolvable:$true] %s31_s20 }
   0x3   :  { %13 = vsyncpa [#allocation4], 0  ;;  %s2734_s21 = smov [#allocation5]   ;;  %s18_s25 = sshll.u32 %s2829_s0, 4  ;;  %s19_s25 = int_to_ptr.hbm [resolvable:$true] %s18_s25 }
   0x4   :  { %s33_s22 = sshll.u32 %s2734_s21, 4  ;;  %s2735_s26 = smov 256   ;;  %s34_s22 = int_to_ptr.vmem [resolvable:$true] %s33_s22 }
   0x5   :  { %s2736_s27 = smov 16   ;;  %s2737_s28 = smov [#allocation2]  }
   0x6   :  { %39 = dma.hbm_to_vmem [thread:$0]  %s32_s20, 16384, %s34_s22, [#allocation6], %s2735_s26, %s2735_s26, %s2736_s27  }
   0x7   :  { %s20_s29 = sshll.u32 %s2737_s28, 4  ;;  %s2738_s1 = smov 512   ;;  %s21_s29 = int_to_ptr.vmem [resolvable:$true] %s20_s29 }
   0x8   :  { %s2739_s30 = smov 32   ;;  %s45_s8 = sshll.u32 %s2831_s2, 4  ;;  %s46_s8 = int_to_ptr.hbm [resolvable:$true] %s45_s8 }
   0x9   :  { %26 = dma.hbm_to_vmem [thread:$0]  %s19_s25, 1024, %s21_s29, [#allocation3], %s2738_s1, %s2738_s1, %s2739_s30  }
   0xa   :  { %s2740_s9 = smov [#allocation7]   ;;  %s55_s12 = sshll.u32 %s2832_s3, 4  ;;  %s56_s12 = int_to_ptr.hbm [resolvable:$true] %s55_s12 }
   0xb   :  { %s47_s0 = sshll.u32 %s2740_s9, 4  ;;  %s2741_s13 = smov [#allocation8]   ;;  %s48_s0 = int_to_ptr.vmem [resolvable:$true] %s47_s0 }
   0xc   :  { %50 = dma.hbm_to_vmem [thread:$0]  %s46_s8, 64, %s48_s0, [#allocation6]  }
   0xd   :  { %s57_s14 = sshll.u32 %s2741_s13, 4  ;;  %s2742_s15 = smov 128   ;;  %s58_s14 = int_to_ptr.vmem [resolvable:$true] %s57_s14 }
   0xe   :  { %s2743_s16 = smov 8  }
   0xf   :  { %63 = dma.hbm_to_vmem [thread:$0]  %s56_s12, 8192, %s58_s14, [#allocation9], %s2742_s15, %s2742_s15, %s2743_s16  }
  0x10   :  { %2726 = dma.done.wait [#allocation3], 1024  }
  0x11   :  { %2727 = vsyncadd [#allocation3], 4294966272 }
  0x12   :  { %2728 = dma.done.wait [#allocation6], 16448  }
  0x13   :  { %2729 = vsyncadd [#allocation6], 4294950848 }
  0x14   :  { %2730 = dma.done.wait [#allocation9], 8192  }
  0x15   :  { %2731 = vsyncadd [#allocation9], 4294959104  ;;  %v1749_v0 = vld [vmem:[#allocation5 + $0xe0] sm:$0xf]  ;;  %v2433_v1 = vld [vmem:[#allocation5 + $0xec] sm:$0xf0] }
  0x16   :  { %v1877_v2 = vld [vmem:[#allocation5 + $0x1e0] sm:$0xf]  ;;  %v1750_v3 = vor.u32 %v2433_v1, %v1749_v0  ;;  %v2465_v4 = vld [vmem:[#allocation5 + $0x1ec] sm:$0xf0]  ;;  %s1620_s20 = sshll.u32 %s2834_s5, 4  ;;  %s1621_s20 = int_to_ptr.hbm [resolvable:$true] %s1620_s20 }
  0x17   :  { %v2005_v5 = vld [vmem:[#allocation5 + $0x2e0] sm:$0xf]  ;;  %v2497_v6 = vld [vmem:[#allocation5 + $0x2ec] sm:$0xf0]  ;;  %v1878_v7 = vor.u32 %v2465_v4, %v1877_v2 }
  0x18   :  { %v2006_v8 = vor.u32 %v2497_v6, %v2005_v5  ;;  %v2133_v9 = vld [vmem:[#allocation5 + $0x3e0] sm:$0xf]  ;;  %v2529_v10 = vld [vmem:[#allocation5 + $0x3ec] sm:$0xf0]  ;;  %872 = vmatpush.bf16.msra.mxu0 %v1750_v3 }
  0x19   :  { %v1733_v11 = vld [vmem:[#allocation5 + $0xc0] sm:$0xf]  ;;  %v2134_v12 = vor.u32 %v2529_v10, %v2133_v9  ;;  %v2429_v13 = vld [vmem:[#allocation5 + $0xcc] sm:$0xf0]  ;;  %886 = vmatpush.bf16.msra.mxu1 %v1878_v7 }
  0x1a   :  { %v1861_v14 = vld [vmem:[#allocation5 + $0x1c0] sm:$0xf]  ;;  %v2461_v15 = vld [vmem:[#allocation5 + $0x1cc] sm:$0xf0]  ;;  %900 = vmatpush.bf16.msra.mxu2 %v2006_v8  ;;  %v1734_v16 = vor.u32 %v2429_v13, %v1733_v11 }
  0x1b   :  { %v1862_v17 = vor.u32 %v2461_v15, %v1861_v14  ;;  %v1989_v18 = vld [vmem:[#allocation5 + $0x2c0] sm:$0xf]  ;;  %v2493_v19 = vld [vmem:[#allocation5 + $0x2cc] sm:$0xf0]  ;;  %914 = vmatpush.bf16.msra.mxu3 %v2134_v12 }
  0x1c   :  { %v2117_v20 = vld [vmem:[#allocation5 + $0x3c0] sm:$0xf]  ;;  %v1990_v21 = vor.u32 %v2493_v19, %v1989_v18  ;;  %v2525_v22 = vld [vmem:[#allocation5 + $0x3cc] sm:$0xf0]  ;;  %873 = vmatpush.bf16.msra.mxu0 %v1734_v16 }
  0x1d   :  { %v1717_v23 = vld [vmem:[#allocation5 + $0xa0] sm:$0xf]  ;;  %v2425_v24 = vld [vmem:[#allocation5 + $0xac] sm:$0xf0]  ;;  %v2118_v25 = vor.u32 %v2525_v22, %v2117_v20  ;;  %887 = vmatpush.bf16.msra.mxu1 %v1862_v17 }
  0x1e   :  { %v1845_v26 = vld [vmem:[#allocation5 + $0x1a0] sm:$0xf]  ;;  %v2457_v27 = vld [vmem:[#allocation5 + $0x1ac] sm:$0xf0]  ;;  %v1718_v29 = vor.u32 %v2425_v24, %v1717_v23  ;;  %901 = vmatpush.bf16.msra.mxu2 %v1990_v21 }
  0x1f   :  { %v1973_v28 = vld [vmem:[#allocation5 + $0x2a0] sm:$0xf]  ;;  %v2489_v30 = vld [vmem:[#allocation5 + $0x2ac] sm:$0xf0]  ;;  %v1846_v33 = vor.u32 %v2457_v27, %v1845_v26  ;;  %915 = vmatpush.bf16.msra.mxu3 %v2118_v25  ;;  %v2431_v27 = vld [vmem:[#allocation5 + $0xe4] sm:$0xf] }
  0x20   :  { %v2101_v31 = vld [vmem:[#allocation5 + $0x3a0] sm:$0xf]  ;;  %v2521_v32 = vld [vmem:[#allocation5 + $0x3ac] sm:$0xf0]  ;;  %v1974_v34 = vor.u32 %v2489_v30, %v1973_v28  ;;  %874 = vmatpush.bf16.msra.mxu0 %v1718_v29  ;;  %v1751_v29 = vld [vmem:[#allocation5 + $0xf0] sm:$0xf0] }
  0x21   :  { %v1701_v35 = vld [vmem:[#allocation5 + $0x80] sm:$0xf]  ;;  %v2421_v36 = vld [vmem:[#allocation5 + $0x8c] sm:$0xf0]  ;;  %v2102_v38 = vor.u32 %v2521_v32, %v2101_v31  ;;  %888 = vmatpush.bf16.msra.mxu1 %v1846_v33  ;;  %v2463_v30 = vld [vmem:[#allocation5 + $0x1e4] sm:$0xf] }
  0x22   :  { %v1829_v37 = vld [vmem:[#allocation5 + $0x180] sm:$0xf]  ;;  %v2453_v39 = vld [vmem:[#allocation5 + $0x18c] sm:$0xf0]  ;;  %v1702_v44 = vor.u32 %v2421_v36, %v1701_v35  ;;  %902 = vmatpush.bf16.msra.mxu2 %v1974_v34  ;;  %v1879_v31 = vld [vmem:[#allocation5 + $0x1f0] sm:$0xf0] }
  0x23   :  { %v1957_v40 = vld [vmem:[#allocation5 + $0x280] sm:$0xf]  ;;  %v2485_v41 = vld [vmem:[#allocation5 + $0x28c] sm:$0xf0]  ;;  %v1830_v45 = vor.u32 %v2453_v39, %v1829_v37  ;;  %916 = vmatpush.bf16.msra.mxu3 %v2102_v38  ;;  %v2495_v32 = vld [vmem:[#allocation5 + $0x2e4] sm:$0xf] }
  0x24   :  { %v2085_v42 = vld [vmem:[#allocation5 + $0x380] sm:$0xf]  ;;  %v2517_v43 = vld [vmem:[#allocation5 + $0x38c] sm:$0xf0]  ;;  %v1958_v46 = vor.u32 %v2485_v41, %v1957_v40  ;;  %875 = vmatpush.bf16.msra.mxu0 %v1702_v44  ;;  %v2007_v33 = vld [vmem:[#allocation5 + $0x2f0] sm:$0xf0] }
  0x25   :  { %v1685_v47 = vld [vmem:[#allocation5 + $0x60] sm:$0xf]  ;;  %v2417_v48 = vld [vmem:[#allocation5 + $0x6c] sm:$0xf0]  ;;  %v2086_v50 = vor.u32 %v2517_v43, %v2085_v42  ;;  %889 = vmatpush.bf16.msra.mxu1 %v1830_v45  ;;  %v2527_v34 = vld [vmem:[#allocation5 + $0x3e4] sm:$0xf]  ;;  %v1754_v45 = vor.u32 %v2431_v27, %v1751_v29 }
  0x26   :  { %v1813_v49 = vld [vmem:[#allocation5 + $0x160] sm:$0xf]  ;;  %v2449_v51 = vld [vmem:[#allocation5 + $0x16c] sm:$0xf0]  ;;  %v1686_v56 = vor.u32 %v2417_v48, %v1685_v47  ;;  %903 = vmatpush.bf16.msra.mxu2 %v1958_v46  ;;  %v2135_v36 = vld [vmem:[#allocation5 + $0x3f0] sm:$0xf0] }
  0x27   :  { %v1941_v52 = vld [vmem:[#allocation5 + $0x260] sm:$0xf]  ;;  %v2481_v53 = vld [vmem:[#allocation5 + $0x26c] sm:$0xf0]  ;;  %v1814_v57 = vor.u32 %v2449_v51, %v1813_v49  ;;  %917 = vmatpush.bf16.msra.mxu3 %v2086_v50  ;;  %v85_v43 = vld [vmem:[#allocation2 + $0x18] sm:$0xff]  ;;  %v1882_v49 = vor.u32 %v2463_v30, %v1879_v31  ;;  %v2010_v50 = vor.u32 %v2495_v32, %v2007_v33 }
  0x28   :  { %v2069_v54 = vld [vmem:[#allocation5 + $0x360] sm:$0xf]  ;;  %v2513_v55 = vld [vmem:[#allocation5 + $0x36c] sm:$0xf0]  ;;  %v1942_v58 = vor.u32 %v2481_v53, %v1941_v52  ;;  %876 = vmatpush.bf16.msra.mxu0 %v1686_v56  ;;  %v89_v46 = vld [vmem:[#allocation2 + $0x38] sm:$0xff] }
  0x29   :  { %v1669_v59 = vld [vmem:[#allocation5 + $0x40] sm:$0xf]  ;;  %v2413_v60 = vld [vmem:[#allocation5 + $0x4c] sm:$0xf0]  ;;  %v2070_v62 = vor.u32 %v2513_v55, %v2069_v54  ;;  %890 = vmatpush.bf16.msra.mxu1 %v1814_v57  ;;  %v2427_v47 = vld [vmem:[#allocation5 + $0xc4] sm:$0xf]  ;;  %v2138_v54 = vor.u32 %v2527_v34, %v2135_v36 }
  0x2a   :  { %v1797_v61 = vld [vmem:[#allocation5 + $0x140] sm:$0xf]  ;;  %v2445_v63 = vld [vmem:[#allocation5 + $0x14c] sm:$0xf0]  ;;  %v1670_v4 = vor.u32 %v2413_v60, %v1669_v59  ;;  %904 = vmatpush.bf16.msra.mxu2 %v1942_v58  ;;  %v1735_v48 = vld [vmem:[#allocation5 + $0xd0] sm:$0xf0]  ;;  %v2794_v60 = vpack.c.bf16 %v89_v46, %v85_v43 }
  0x2b   :  { %v1925_v0 = vld [vmem:[#allocation5 + $0x240] sm:$0xf]  ;;  %v2477_v1 = vld [vmem:[#allocation5 + $0x24c] sm:$0xf0]  ;;  %v1798_v6 = vor.u32 %v2445_v63, %v1797_v61  ;;  %918 = vmatpush.bf16.msra.mxu3 %v2070_v62  ;;  %v2459_v51 = vld [vmem:[#allocation5 + $0x1c4] sm:$0xf]  ;;  %v1738_v63 = vor.u32 %v2427_v47, %v1735_v48 }
  0x2c   :  { %v2053_v2 = vld [vmem:[#allocation5 + $0x340] sm:$0xf]  ;;  %v2509_v3 = vld [vmem:[#allocation5 + $0x34c] sm:$0xf0]  ;;  %v1926_v7 = vor.u32 %v2477_v1, %v1925_v0  ;;  %877 = vmatpush.bf16.msra.mxu0 %v1670_v4  ;;  %v83_v52 = vld [vmem:[#allocation2 + $0x8] sm:$0xff] }
  0x2d   :  { %v1653_v5 = vld [vmem:[#allocation5 + $0x20] sm:$0xf]  ;;  %v2409_v8 = vld [vmem:[#allocation5 + $0x2c] sm:$0xf0]  ;;  %v2054_v11 = vor.u32 %v2509_v3, %v2053_v2  ;;  %891 = vmatpush.bf16.msra.mxu1 %v1798_v6  ;;  %v87_v53 = vld [vmem:[#allocation2 + $0x28] sm:$0xff] }
  0x2e   :  { %v1781_v9 = vld [vmem:[#allocation5 + $0x120] sm:$0xf]  ;;  %v2441_v10 = vld [vmem:[#allocation5 + $0x12c] sm:$0xf0]  ;;  %v1654_v18 = vor.u32 %v2409_v8, %v1653_v5  ;;  %905 = vmatpush.bf16.msra.mxu2 %v1926_v7  ;;  %v1863_v56 = vld [vmem:[#allocation5 + $0x1d0] sm:$0xf0]  ;;  %v2796_v0 = vpack.c.bf16 %v87_v53, %v83_v52 }
  0x2f   :  { %v1909_v12 = vld [vmem:[#allocation5 + $0x220] sm:$0xf]  ;;  %v2473_v13 = vld [vmem:[#allocation5 + $0x22c] sm:$0xf0]  ;;  %v1782_v23 = vor.u32 %v2441_v10, %v1781_v9  ;;  %919 = vmatpush.bf16.msra.mxu3 %v2054_v11  ;;  %v2491_v57 = vld [vmem:[#allocation5 + $0x2c4] sm:$0xf]  ;;  %v1866_v1 = vor.u32 %v2459_v51, %v1863_v56 }
  0x30   :  { %v2037_v14 = vld [vmem:[#allocation5 + $0x320] sm:$0xf]  ;;  %v2505_v15 = vld [vmem:[#allocation5 + $0x32c] sm:$0xf0]  ;;  %v1910_v24 = vor.u32 %v2473_v13, %v1909_v12  ;;  %878 = vmatpush.bf16.msra.mxu0 %v1654_v18  ;;  %v1991_v58 = vld [vmem:[#allocation5 + $0x2d0] sm:$0xf0] }
  0x31   :  { %v1637_v16 = vld [vmem:[#allocation5] sm:$0xf]  ;;  %v2405_v17 = vld [vmem:[#allocation5 + $0xc] sm:$0xf0]  ;;  %v2038_v28 = vor.u32 %v2505_v15, %v2037_v14  ;;  %892 = vmatpush.bf16.msra.mxu1 %v1782_v23  ;;  %v2523_v61 = vld [vmem:[#allocation5 + $0x3c4] sm:$0xf]  ;;  %v1994_v2 = vor.u32 %v2491_v57, %v1991_v58 }
  0x32   :  { %v1765_v19 = vld [vmem:[#allocation5 + $0x100] sm:$0xf]  ;;  %v2437_v20 = vld [vmem:[#allocation5 + $0x10c] sm:$0xf0]  ;;  %v1638_v35 = vor.u32 %v2405_v17, %v1637_v16  ;;  %906 = vmatpush.bf16.msra.mxu2 %v1910_v24  ;;  %v2119_v62 = vld [vmem:[#allocation5 + $0x3d0] sm:$0xf0] }
  0x33   :  { %v1893_v21 = vld [vmem:[#allocation5 + $0x200] sm:$0xf]  ;;  %v2469_v22 = vld [vmem:[#allocation5 + $0x20c] sm:$0xf0]  ;;  %v1766_v39 = vor.u32 %v2437_v20, %v1765_v19  ;;  %920 = vmatpush.bf16.msra.mxu3 %v2038_v28  ;;  %v2423_v3 = vld [vmem:[#allocation5 + $0xa4] sm:$0xf]  ;;  %v2122_v6 = vor.u32 %v2523_v61, %v2119_v62 }
  0x34   :  { %v2021_v25 = vld [vmem:[#allocation5 + $0x300] sm:$0xf]  ;;  %v2501_v26 = vld [vmem:[#allocation5 + $0x30c] sm:$0xf0]  ;;  %v1894_v40 = vor.u32 %v2469_v22, %v1893_v21  ;;  %879 = vmatpush.bf16.msra.mxu0 %v1638_v35  ;;  %v1719_v4 = vld [vmem:[#allocation5 + $0xb0] sm:$0xf0] }
  0x35   :  { %v84_v37 = vld [vmem:[#allocation2 + $0x10] sm:$0xff]  ;;  %v82_v41 = vld [vmem:[#allocation2] sm:$0xff]  ;;  %v2022_v44 = vor.u32 %v2501_v26, %v2021_v25  ;;  %893 = vmatpush.bf16.msra.mxu1 %v1766_v39  ;;  %v1722_v12 = vor.u32 %v2423_v3, %v1719_v4 }
  0x36   :  { %v88_v38 = vld [vmem:[#allocation2 + $0x30] sm:$0xff]  ;;  %v86_v42 = vld [vmem:[#allocation2 + $0x20] sm:$0xff]  ;;  %907 = vmatpush.bf16.msra.mxu2 %v1894_v40 }
  0x37   :  { %v2790_v55 = vpack.c.bf16 %v88_v38, %v84_v37  ;;  %v2792_v59 = vpack.c.bf16 %v86_v42, %v82_v41  ;;  %921 = vmatpush.bf16.msra.mxu3 %v2022_v44  ;;  %v2455_v5 = vld [vmem:[#allocation5 + $0x1a4] sm:$0xf]  ;;  %v1847_v7 = vld [vmem:[#allocation5 + $0x1b0] sm:$0xf0] }
  0x38   :  { %928 = vmatpush.bf16.msrb.mxu0 %v1754_v45  ;;  %v2487_v8 = vld [vmem:[#allocation5 + $0x2a4] sm:$0xf]  ;;  %v1975_v9 = vld [vmem:[#allocation5 + $0x2b0] sm:$0xf0]  ;;  %894 = vmatmul.bf16.vlgmr.msra.gmra.mxu1 %v2796_v0  ;;  %v1850_v13 = vor.u32 %v2455_v5, %v1847_v7 }
  0x39   :  { %942 = vmatpush.bf16.msrb.mxu1 %v1882_v49  ;;  %908 = vmatmul.bf16.vlgmr.msra.gmra.mxu2 %v2790_v55  ;;  %v2519_v10 = vld [vmem:[#allocation5 + $0x3a4] sm:$0xf]  ;;  %v2103_v11 = vld [vmem:[#allocation5 + $0x3b0] sm:$0xf0]  ;;  %v1978_v14 = vor.u32 %v2487_v8, %v1975_v9 }
  0x3a   :  { %956 = vmatpush.bf16.msrb.mxu2 %v2010_v50  ;;  %880 = vmatmul.bf16.vlgmr.msra.gmra.mxu0 %v2792_v59  ;;  %v2419_v15 = vld [vmem:[#allocation5 + $0x84] sm:$0xf]  ;;  %v1703_v16 = vld [vmem:[#allocation5 + $0x90] sm:$0xf0]  ;;  %v2106_v18 = vor.u32 %v2519_v10, %v2103_v11 }
  0x3b   :  { %970 = vmatpush.bf16.msrb.mxu3 %v2138_v54  ;;  %v2451_v17 = vld [vmem:[#allocation5 + $0x184] sm:$0xf]  ;;  %v1831_v19 = vld [vmem:[#allocation5 + $0x190] sm:$0xf0]  ;;  %v1706_v24 = vor.u32 %v2419_v15, %v1703_v16  ;;  %v2466_v16 = vld [vmem:[#allocation5 + $0x1f4] sm:$0xf0] }
  0x3c   :  { %922 = vmatmul.bf16.vlgmr.msra.gmra.mxu3 %v2794_v60  ;;  %929 = vmatpush.bf16.msrb.mxu0 %v1738_v63  ;;  %v2483_v20 = vld [vmem:[#allocation5 + $0x284] sm:$0xf]  ;;  %v1959_v21 = vld [vmem:[#allocation5 + $0x290] sm:$0xf0]  ;;  %v1834_v25 = vor.u32 %v2451_v17, %v1831_v19  ;;  %v2013_v17 = vld [vmem:[#allocation5 + $0x2e8] sm:$0xf] }
  0x3d   :  { %943 = vmatpush.bf16.msrb.mxu1 %v1866_v1  ;;  %v2515_v22 = vld [vmem:[#allocation5 + $0x384] sm:$0xf]  ;;  %v2087_v23 = vld [vmem:[#allocation5 + $0x390] sm:$0xf0]  ;;  %v1962_v26 = vor.u32 %v2483_v20, %v1959_v21  ;;  %v2141_v21 = vld [vmem:[#allocation5 + $0x3e8] sm:$0xf] }
  0x3e   :  { %957 = vmatpush.bf16.msrb.mxu2 %v1994_v2  ;;  %v2415_v27 = vld [vmem:[#allocation5 + $0x64] sm:$0xf]  ;;  %v1687_v28 = vld [vmem:[#allocation5 + $0x70] sm:$0xf0]  ;;  %v2090_v30 = vor.u32 %v2515_v22, %v2087_v23  ;;  %v2530_v22 = vld [vmem:[#allocation5 + $0x3f4] sm:$0xf0] }
  0x3f   :  { %971 = vmatpush.bf16.msrb.mxu3 %v2122_v6  ;;  %v2447_v29 = vld [vmem:[#allocation5 + $0x164] sm:$0xf]  ;;  %v1815_v31 = vld [vmem:[#allocation5 + $0x170] sm:$0xf0]  ;;  %v1690_v36 = vor.u32 %v2415_v27, %v1687_v28  ;;  %v1741_v27 = vld [vmem:[#allocation5 + $0xc8] sm:$0xf] }
  0x40   :  { %930 = vmatpush.bf16.msrb.mxu0 %v1722_v12  ;;  %v2479_v32 = vld [vmem:[#allocation5 + $0x264] sm:$0xf]  ;;  %v1943_v33 = vld [vmem:[#allocation5 + $0x270] sm:$0xf0]  ;;  %v1818_v37 = vor.u32 %v2447_v29, %v1815_v31  ;;  %v1757_v12 = vld [vmem:[#allocation5 + $0xe8] sm:$0xf] }
  0x41   :  { %944 = vmatpush.bf16.msrb.mxu1 %v1850_v13  ;;  %v2511_v34 = vld [vmem:[#allocation5 + $0x364] sm:$0xf]  ;;  %v2071_v35 = vld [vmem:[#allocation5 + $0x370] sm:$0xf0]  ;;  %v1946_v38 = vor.u32 %v2479_v32, %v1943_v33  ;;  %v2434_v13 = vld [vmem:[#allocation5 + $0xf4] sm:$0xf0] }
  0x42   :  { %958 = vmatpush.bf16.msrb.mxu2 %v1978_v14  ;;  %v2411_v39 = vld [vmem:[#allocation5 + $0x44] sm:$0xf]  ;;  %v1671_v40 = vld [vmem:[#allocation5 + $0x50] sm:$0xf0]  ;;  %v2074_v42 = vor.u32 %v2511_v34, %v2071_v35  ;;  %v1885_v14 = vld [vmem:[#allocation5 + $0x1e8] sm:$0xf] }
  0x43   :  { %972 = vmatpush.bf16.msrb.mxu3 %v2106_v18  ;;  %v2443_v41 = vld [vmem:[#allocation5 + $0x144] sm:$0xf]  ;;  %v1799_v43 = vld [vmem:[#allocation5 + $0x150] sm:$0xf0]  ;;  %v1674_v48 = vor.u32 %v2411_v39, %v1671_v40  ;;  %v2498_v18 = vld [vmem:[#allocation5 + $0x2f4] sm:$0xf0] }
  0x44   :  { %931 = vmatpush.bf16.msrb.mxu0 %v1706_v24  ;;  %v2475_v44 = vld [vmem:[#allocation5 + $0x244] sm:$0xf]  ;;  %v1927_v45 = vld [vmem:[#allocation5 + $0x250] sm:$0xf0]  ;;  %v1802_v49 = vor.u32 %v2443_v41, %v1799_v43  ;;  %v1758_v24 = vor.u32 %v2434_v13, %v1757_v12  ;;  %v2430_v28 = vld [vmem:[#allocation5 + $0xd4] sm:$0xf0] }
  0x45   :  { %945 = vmatpush.bf16.msrb.mxu1 %v1834_v25  ;;  %v2507_v46 = vld [vmem:[#allocation5 + $0x344] sm:$0xf]  ;;  %v2055_v47 = vld [vmem:[#allocation5 + $0x350] sm:$0xf0]  ;;  %v1930_v50 = vor.u32 %v2475_v44, %v1927_v45  ;;  %v1886_v25 = vor.u32 %v2466_v16, %v1885_v14  ;;  %v1869_v29 = vld [vmem:[#allocation5 + $0x1c8] sm:$0xf] }
  0x46   :  { %959 = vmatpush.bf16.msrb.mxu2 %v1962_v26  ;;  %v2407_v51 = vld [vmem:[#allocation5 + $0x24] sm:$0xf]  ;;  %v1655_v52 = vld [vmem:[#allocation5 + $0x30] sm:$0xf0]  ;;  %v2058_v54 = vor.u32 %v2507_v46, %v2055_v47  ;;  %v2014_v26 = vor.u32 %v2498_v18, %v2013_v17  ;;  %v2462_v31 = vld [vmem:[#allocation5 + $0x1d4] sm:$0xf0] }
  0x47   :  { %973 = vmatpush.bf16.msrb.mxu3 %v2090_v30  ;;  %v2439_v53 = vld [vmem:[#allocation5 + $0x124] sm:$0xf]  ;;  %v1783_v56 = vld [vmem:[#allocation5 + $0x130] sm:$0xf0]  ;;  %v1658_v63 = vor.u32 %v2407_v51, %v1655_v52  ;;  %v2142_v30 = vor.u32 %v2530_v22, %v2141_v21  ;;  %v1997_v32 = vld [vmem:[#allocation5 + $0x2c8] sm:$0xf] }
  0x48   :  { %932 = vmatpush.bf16.msrb.mxu0 %v1690_v36  ;;  %v2471_v57 = vld [vmem:[#allocation5 + $0x224] sm:$0xf]  ;;  %v1911_v58 = vld [vmem:[#allocation5 + $0x230] sm:$0xf0]  ;;  %v1786_v3 = vor.u32 %v2439_v53, %v1783_v56  ;;  %v2494_v33 = vld [vmem:[#allocation5 + $0x2d4] sm:$0xf0]  ;;  %v1742_v36 = vor.u32 %v2430_v28, %v1741_v27 }
  0x49   :  { %946 = vmatpush.bf16.msrb.mxu1 %v1818_v37  ;;  %v2503_v61 = vld [vmem:[#allocation5 + $0x324] sm:$0xf]  ;;  %v2039_v62 = vld [vmem:[#allocation5 + $0x330] sm:$0xf0]  ;;  %v1914_v4 = vor.u32 %v2471_v57, %v1911_v58  ;;  %v2125_v34 = vld [vmem:[#allocation5 + $0x3c8] sm:$0xf]  ;;  %v1870_v37 = vor.u32 %v2462_v31, %v1869_v29 }
  0x4a   :  { %960 = vmatpush.bf16.msrb.mxu2 %v1946_v38  ;;  %v2403_v1 = vld [vmem:[#allocation5 + $0x4] sm:$0xf]  ;;  %v1639_v2 = vld [vmem:[#allocation5 + $0x10] sm:$0xf0]  ;;  %v2042_v8 = vor.u32 %v2503_v61, %v2039_v62  ;;  %v2526_v35 = vld [vmem:[#allocation5 + $0x3d4] sm:$0xf0]  ;;  %v1998_v38 = vor.u32 %v2494_v33, %v1997_v32 }
  0x4b   :  { %974 = vmatpush.bf16.msrb.mxu3 %v2074_v42  ;;  %v2435_v5 = vld [vmem:[#allocation5 + $0x104] sm:$0xf]  ;;  %v1767_v6 = vld [vmem:[#allocation5 + $0x110] sm:$0xf0]  ;;  %v1642_v15 = vor.u32 %v2403_v1, %v1639_v2  ;;  %v1725_v39 = vld [vmem:[#allocation5 + $0xa8] sm:$0xf]  ;;  %v2126_v42 = vor.u32 %v2526_v35, %v2125_v34 }
  0x4c   :  { %933 = vmatpush.bf16.msrb.mxu0 %v1674_v48  ;;  %v2467_v7 = vld [vmem:[#allocation5 + $0x204] sm:$0xf]  ;;  %v1895_v9 = vld [vmem:[#allocation5 + $0x210] sm:$0xf0]  ;;  %v1770_v19 = vor.u32 %v2435_v5, %v1767_v6  ;;  %v2426_v40 = vld [vmem:[#allocation5 + $0xb4] sm:$0xf0] }
  0x4d   :  { %947 = vmatpush.bf16.msrb.mxu1 %v1802_v49  ;;  %v2499_v10 = vld [vmem:[#allocation5 + $0x304] sm:$0xf]  ;;  %v2023_v11 = vld [vmem:[#allocation5 + $0x310] sm:$0xf0]  ;;  %v1898_v20 = vor.u32 %v2467_v7, %v1895_v9  ;;  %v1853_v41 = vld [vmem:[#allocation5 + $0x1a8] sm:$0xf]  ;;  %v1726_v48 = vor.u32 %v2426_v40, %v1725_v39 }
  0x4e   :  { %961 = vmatpush.bf16.msrb.mxu2 %v1930_v50  ;;  %v2026_v23 = vor.u32 %v2499_v10, %v2023_v11  ;;  %v2458_v43 = vld [vmem:[#allocation5 + $0x1b4] sm:$0xf0]  ;;  %v1981_v44 = vld [vmem:[#allocation5 + $0x2a8] sm:$0xf] }
  0x4f   :  { %975 = vmatpush.bf16.msrb.mxu3 %v2058_v54  ;;  %v2490_v45 = vld [vmem:[#allocation5 + $0x2b4] sm:$0xf0]  ;;  %v2109_v46 = vld [vmem:[#allocation5 + $0x3a8] sm:$0xf]  ;;  %v1854_v49 = vor.u32 %v2458_v43, %v1853_v41 }
  0x50   :  { %934 = vmatpush.bf16.msrb.mxu0 %v1658_v63  ;;  %v2522_v47 = vld [vmem:[#allocation5 + $0x3b4] sm:$0xf0]  ;;  %v1982_v50 = vor.u32 %v2490_v45, %v1981_v44  ;;  %v1709_v51 = vld [vmem:[#allocation5 + $0x88] sm:$0xf] }
  0x51   :  { %948 = vmatpush.bf16.msrb.mxu1 %v1786_v3  ;;  %v2422_v52 = vld [vmem:[#allocation5 + $0x94] sm:$0xf0]  ;;  %v1837_v53 = vld [vmem:[#allocation5 + $0x188] sm:$0xf]  ;;  %v2110_v54 = vor.u32 %v2522_v47, %v2109_v46 }
  0x52   :  { %962 = vmatpush.bf16.msrb.mxu2 %v1914_v4  ;;  %v2454_v56 = vld [vmem:[#allocation5 + $0x194] sm:$0xf0]  ;;  %v1965_v57 = vld [vmem:[#allocation5 + $0x288] sm:$0xf]  ;;  %v1710_v63 = vor.u32 %v2422_v52, %v1709_v51  ;;  %v1887_v52 = vld [vmem:[#allocation5 + $0x1f8] sm:$0xf0] }
  0x53   :  { %976 = vmatpush.bf16.msrb.mxu3 %v2042_v8  ;;  %v2486_v58 = vld [vmem:[#allocation5 + $0x294] sm:$0xf0]  ;;  %v2093_v61 = vld [vmem:[#allocation5 + $0x388] sm:$0xf]  ;;  %v1838_v1 = vor.u32 %v2454_v56, %v1837_v53  ;;  %v2496_v53 = vld [vmem:[#allocation5 + $0x2ec] sm:$0xf] }
  0x54   :  { %935 = vmatpush.bf16.msrb.mxu0 %v1642_v15  ;;  %v2518_v62 = vld [vmem:[#allocation5 + $0x394] sm:$0xf0]  ;;  %v1966_v2 = vor.u32 %v2486_v58, %v1965_v57  ;;  %v1693_v3 = vld [vmem:[#allocation5 + $0x68] sm:$0xf]  ;;  %v2528_v58 = vld [vmem:[#allocation5 + $0x3ec] sm:$0xf] }
  0x55   :  { %949 = vmatpush.bf16.msrb.mxu1 %v1770_v19  ;;  %v2418_v4 = vld [vmem:[#allocation5 + $0x74] sm:$0xf0]  ;;  %v1821_v5 = vld [vmem:[#allocation5 + $0x168] sm:$0xf]  ;;  %v2094_v6 = vor.u32 %v2518_v62, %v2093_v61  ;;  %v2143_v61 = vld [vmem:[#allocation5 + $0x3f8] sm:$0xf0] }
  0x56   :  { %963 = vmatpush.bf16.msrb.mxu2 %v1898_v20  ;;  %v2450_v7 = vld [vmem:[#allocation5 + $0x174] sm:$0xf0]  ;;  %v1949_v8 = vld [vmem:[#allocation5 + $0x268] sm:$0xf]  ;;  %v1694_v12 = vor.u32 %v2418_v4, %v1693_v3  ;;  %v2428_v3 = vld [vmem:[#allocation5 + $0xcc] sm:$0xf] }
  0x57   :  { %977 = vmatpush.bf16.msrb.mxu3 %v2026_v23  ;;  %936 = vmatmul.bf16.vlgmr.msrb.gmra.mxu0 %v2792_v59  ;;  %v2482_v9 = vld [vmem:[#allocation5 + $0x274] sm:$0xf0]  ;;  %v2077_v10 = vld [vmem:[#allocation5 + $0x368] sm:$0xf]  ;;  %v1822_v13 = vor.u32 %v2450_v7, %v1821_v5  ;;  %v1743_v4 = vld [vmem:[#allocation5 + $0xd8] sm:$0xf0] }
  0x58   :  { %984 = vmatpush.bf16.msra.mxu0 %v1758_v24  ;;  %950 = vmatmul.bf16.vlgmr.msrb.gmra.mxu1 %v2796_v0  ;;  %v2514_v11 = vld [vmem:[#allocation5 + $0x374] sm:$0xf0]  ;;  %v1950_v14 = vor.u32 %v2482_v9, %v1949_v8  ;;  %v1677_v15 = vld [vmem:[#allocation5 + $0x48] sm:$0xf]  ;;  %v2460_v5 = vld [vmem:[#allocation5 + $0x1cc] sm:$0xf] }
  0x59   :  { %998 = vmatpush.bf16.msra.mxu1 %v1886_v25  ;;  %964 = vmatmul.bf16.vlgmr.msrb.gmra.mxu2 %v2790_v55  ;;  %v2414_v16 = vld [vmem:[#allocation5 + $0x54] sm:$0xf0]  ;;  %v1805_v17 = vld [vmem:[#allocation5 + $0x148] sm:$0xf]  ;;  %v2078_v18 = vor.u32 %v2514_v11, %v2077_v10  ;;  %v1871_v7 = vld [vmem:[#allocation5 + $0x1d8] sm:$0xf0] }
  0x5a   :  { %1012 = vmatpush.bf16.msra.mxu2 %v2014_v26  ;;  %978 = vmatmul.bf16.vlgmr.msrb.gmra.mxu3 %v2794_v60  ;;  %v2446_v19 = vld [vmem:[#allocation5 + $0x154] sm:$0xf0]  ;;  %v1933_v20 = vld [vmem:[#allocation5 + $0x248] sm:$0xf]  ;;  %v1678_v24 = vor.u32 %v2414_v16, %v1677_v15  ;;  %v2492_v8 = vld [vmem:[#allocation5 + $0x2cc] sm:$0xf] }
  0x5b   :  { %1026 = vmatpush.bf16.msra.mxu3 %v2142_v30  ;;  %v2478_v21 = vld [vmem:[#allocation5 + $0x254] sm:$0xf0]  ;;  %v2061_v22 = vld [vmem:[#allocation5 + $0x348] sm:$0xf]  ;;  %v1806_v25 = vor.u32 %v2446_v19, %v1805_v17  ;;  %v1999_v9 = vld [vmem:[#allocation5 + $0x2d8] sm:$0xf0] }
  0x5c   :  { %985 = vmatpush.bf16.msra.mxu0 %v1742_v36  ;;  %v2510_v23 = vld [vmem:[#allocation5 + $0x354] sm:$0xf0]  ;;  %v1934_v26 = vor.u32 %v2478_v21, %v1933_v20  ;;  %v1661_v27 = vld [vmem:[#allocation5 + $0x28] sm:$0xf]  ;;  %v2524_v10 = vld [vmem:[#allocation5 + $0x3cc] sm:$0xf] }
  0x5d   :  { %999 = vmatpush.bf16.msra.mxu1 %v1870_v37  ;;  %v2410_v28 = vld [vmem:[#allocation5 + $0x34] sm:$0xf0]  ;;  %v1789_v29 = vld [vmem:[#allocation5 + $0x128] sm:$0xf]  ;;  %v2062_v30 = vor.u32 %v2510_v23, %v2061_v22  ;;  %v2127_v11 = vld [vmem:[#allocation5 + $0x3d8] sm:$0xf0] }
  0x5e   :  { %1013 = vmatpush.bf16.msra.mxu2 %v1998_v38  ;;  %v2442_v31 = vld [vmem:[#allocation5 + $0x134] sm:$0xf0]  ;;  %v1917_v32 = vld [vmem:[#allocation5 + $0x228] sm:$0xf]  ;;  %v1662_v36 = vor.u32 %v2410_v28, %v1661_v27  ;;  %v2424_v15 = vld [vmem:[#allocation5 + $0xac] sm:$0xf] }
  0x5f   :  { %1027 = vmatpush.bf16.msra.mxu3 %v2126_v42  ;;  %v2474_v33 = vld [vmem:[#allocation5 + $0x234] sm:$0xf0]  ;;  %v2045_v34 = vld [vmem:[#allocation5 + $0x328] sm:$0xf]  ;;  %v1790_v39 = vor.u32 %v2442_v31, %v1789_v29  ;;  %v1727_v16 = vld [vmem:[#allocation5 + $0xb8] sm:$0xf0] }
  0x60   :  { %986 = vmatpush.bf16.msra.mxu0 %v1726_v48  ;;  %v2506_v35 = vld [vmem:[#allocation5 + $0x334] sm:$0xf0]  ;;  %v1645_v37 = vld [vmem:[#allocation5 + $0x8] sm:$0xf]  ;;  %v1918_v40 = vor.u32 %v2474_v33, %v1917_v32  ;;  %v2432_v48 = vld [vmem:[#allocation5 + $0xec] sm:$0xf] }
  0x61   :  { %1000 = vmatpush.bf16.msra.mxu1 %v1854_v49  ;;  %v2406_v38 = vld [vmem:[#allocation5 + $0x14] sm:$0xf0]  ;;  %v1773_v41 = vld [vmem:[#allocation5 + $0x108] sm:$0xf]  ;;  %v2046_v44 = vor.u32 %v2506_v35, %v2045_v34  ;;  %v1759_v49 = vld [vmem:[#allocation5 + $0xf8] sm:$0xf0] }
  0x62   :  { %1014 = vmatpush.bf16.msra.mxu2 %v1982_v50  ;;  %v2438_v42 = vld [vmem:[#allocation5 + $0x114] sm:$0xf0]  ;;  %v1901_v43 = vld [vmem:[#allocation5 + $0x208] sm:$0xf]  ;;  %v2464_v50 = vld [vmem:[#allocation5 + $0x1ec] sm:$0xf]  ;;  %v1646_v51 = vor.u32 %v2406_v38, %v1645_v37 }
  0x63   :  { %1028 = vmatpush.bf16.msra.mxu3 %v2110_v54  ;;  %v2470_v45 = vld [vmem:[#allocation5 + $0x214] sm:$0xf0]  ;;  %v2029_v46 = vld [vmem:[#allocation5 + $0x308] sm:$0xf]  ;;  %v2015_v54 = vld [vmem:[#allocation5 + $0x2f8] sm:$0xf0]  ;;  %v1774_v56 = vor.u32 %v2438_v42, %v1773_v41 }
  0x64   :  { %987 = vmatpush.bf16.msra.mxu0 %v1710_v63  ;;  %v2502_v47 = vld [vmem:[#allocation5 + $0x314] sm:$0xf0]  ;;  %v1902_v57 = vor.u32 %v2470_v45, %v1901_v43  ;;  %v1762_v63 = vor.u32 %v2432_v48, %v1759_v49  ;;  %v2456_v17 = vld [vmem:[#allocation5 + $0x1ac] sm:$0xf]  ;;  %v1855_v19 = vld [vmem:[#allocation5 + $0x1b8] sm:$0xf0] }
  0x65   :  { %1001 = vmatpush.bf16.msra.mxu1 %v1838_v1  ;;  %v2030_v62 = vor.u32 %v2502_v47, %v2029_v46  ;;  %v1890_v1 = vor.u32 %v2464_v50, %v1887_v52  ;;  %v2488_v20 = vld [vmem:[#allocation5 + $0x2ac] sm:$0xf]  ;;  %v1983_v21 = vld [vmem:[#allocation5 + $0x2b8] sm:$0xf0] }
  0x66   :  { %1015 = vmatpush.bf16.msra.mxu2 %v1966_v2  ;;  %v2018_v2 = vor.u32 %v2496_v53, %v2015_v54  ;;  %v2520_v22 = vld [vmem:[#allocation5 + $0x3ac] sm:$0xf]  ;;  %v2111_v23 = vld [vmem:[#allocation5 + $0x3b8] sm:$0xf0] }
  0x67   :  { %1029 = vmatpush.bf16.msra.mxu3 %v2094_v6  ;;  %v2146_v6 = vor.u32 %v2528_v58, %v2143_v61  ;;  %v2420_v27 = vld [vmem:[#allocation5 + $0x8c] sm:$0xf]  ;;  %v1711_v28 = vld [vmem:[#allocation5 + $0x98] sm:$0xf0] }
  0x68   :  { %988 = vmatpush.bf16.msra.mxu0 %v1694_v12  ;;  %v1746_v12 = vor.u32 %v2428_v3, %v1743_v4  ;;  %v2452_v29 = vld [vmem:[#allocation5 + $0x18c] sm:$0xf]  ;;  %v1839_v31 = vld [vmem:[#allocation5 + $0x198] sm:$0xf0] }
  0x69   :  { %1002 = vmatpush.bf16.msra.mxu1 %v1822_v13  ;;  %v1874_v13 = vor.u32 %v2460_v5, %v1871_v7  ;;  %v2484_v32 = vld [vmem:[#allocation5 + $0x28c] sm:$0xf]  ;;  %v1967_v33 = vld [vmem:[#allocation5 + $0x298] sm:$0xf0]  ;;  %v1842_v37 = vor.u32 %v2452_v29, %v1839_v31  ;;  %v2197_v31 = vld [vmem:[#allocation8 + $0x60] sm:$0xf] }
  0x6a   :  { %1016 = vmatpush.bf16.msra.mxu2 %v1950_v14  ;;  %v2002_v14 = vor.u32 %v2492_v8, %v1999_v9  ;;  %v2516_v34 = vld [vmem:[#allocation5 + $0x38c] sm:$0xf]  ;;  %v2095_v35 = vld [vmem:[#allocation5 + $0x398] sm:$0xf0]  ;;  %v1970_v38 = vor.u32 %v2484_v32, %v1967_v33 }
  0x6b   :  { %1030 = vmatpush.bf16.msra.mxu3 %v2078_v18  ;;  %v2130_v18 = vor.u32 %v2524_v10, %v2127_v11  ;;  %v2448_v41 = vld [vmem:[#allocation5 + $0x16c] sm:$0xf]  ;;  %v2098_v42 = vor.u32 %v2516_v34, %v2095_v35  ;;  %v1823_v43 = vld [vmem:[#allocation5 + $0x178] sm:$0xf0]  ;;  %v2189_v34 = vld [vmem:[#allocation8 + $0x50] sm:$0xf] }
  0x6c   :  { %989 = vmatpush.bf16.msra.mxu0 %v1678_v24  ;;  %v1730_v24 = vor.u32 %v2424_v15, %v1727_v16  ;;  %v1951_v45 = vld [vmem:[#allocation5 + $0x278] sm:$0xf0]  ;;  %v2512_v46 = vld [vmem:[#allocation5 + $0x36c] sm:$0xf]  ;;  %v1826_v49 = vor.u32 %v2448_v41, %v1823_v43  ;;  %v2165_v43 = vld [vmem:[#allocation8 + $0x20] sm:$0xf] }
  0x6d   :  { %1003 = vmatpush.bf16.msra.mxu1 %v1806_v25  ;;  %v1858_v25 = vor.u32 %v2456_v17, %v1855_v19  ;;  %v2079_v47 = vld [vmem:[#allocation5 + $0x378] sm:$0xf0]  ;;  %v2444_v53 = vld [vmem:[#allocation5 + $0x14c] sm:$0xf] }
  0x6e   :  { %1017 = vmatpush.bf16.msra.mxu2 %v1934_v26  ;;  %v1986_v26 = vor.u32 %v2488_v20, %v1983_v21  ;;  %v1679_v52 = vld [vmem:[#allocation5 + $0x58] sm:$0xf0]  ;;  %v2082_v54 = vor.u32 %v2512_v46, %v2079_v47  ;;  %v2508_v61 = vld [vmem:[#allocation5 + $0x34c] sm:$0xf] }
  0x6f   :  { %1031 = vmatpush.bf16.msra.mxu3 %v2062_v30  ;;  %v2114_v30 = vor.u32 %v2520_v22, %v2111_v23  ;;  %v1935_v58 = vld [vmem:[#allocation5 + $0x258] sm:$0xf0]  ;;  %v2408_v3 = vld [vmem:[#allocation5 + $0x2c] sm:$0xf] }
  0x70   :  { %990 = vmatpush.bf16.msra.mxu0 %v1662_v36  ;;  %v1714_v36 = vor.u32 %v2420_v27, %v1711_v28  ;;  %v1663_v4 = vld [vmem:[#allocation5 + $0x38] sm:$0xf0]  ;;  %v2440_v5 = vld [vmem:[#allocation5 + $0x12c] sm:$0xf] }
  0x71   :  { %1004 = vmatpush.bf16.msra.mxu1 %v1790_v39  ;;  %v2416_v39 = vld [vmem:[#allocation5 + $0x6c] sm:$0xf]  ;;  %v1791_v7 = vld [vmem:[#allocation5 + $0x138] sm:$0xf0] }
  0x72   :  { %1018 = vmatpush.bf16.msra.mxu2 %v1918_v40  ;;  %v1695_v40 = vld [vmem:[#allocation5 + $0x78] sm:$0xf0]  ;;  %v2472_v8 = vld [vmem:[#allocation5 + $0x22c] sm:$0xf] }
  0x73   :  { %1032 = vmatpush.bf16.msra.mxu3 %v2046_v44  ;;  %v2480_v44 = vld [vmem:[#allocation5 + $0x26c] sm:$0xf]  ;;  %v1698_v48 = vor.u32 %v2416_v39, %v1695_v40  ;;  %v1919_v9 = vld [vmem:[#allocation5 + $0x238] sm:$0xf0]  ;;  %v2173_v40 = vld [vmem:[#allocation8 + $0x30] sm:$0xf] }
  0x74   :  { %991 = vmatpush.bf16.msra.mxu0 %v1646_v51  ;;  %v1954_v50 = vor.u32 %v2480_v44, %v1951_v45  ;;  %v2412_v51 = vld [vmem:[#allocation5 + $0x4c] sm:$0xf]  ;;  %v2047_v11 = vld [vmem:[#allocation5 + $0x338] sm:$0xf0]  ;;  %v1922_v15 = vor.u32 %v2472_v8, %v1919_v9  ;;  %v2269_v44 = vld [vmem:[#allocation8 + $0xf0] sm:$0xf] }
  0x75   :  { %1005 = vmatpush.bf16.msra.mxu1 %v1774_v56  ;;  %v1807_v56 = vld [vmem:[#allocation5 + $0x158] sm:$0xf0]  ;;  %v2504_v10 = vld [vmem:[#allocation5 + $0x32c] sm:$0xf]  ;;  %v2541_v8 = vld [vmem:[#allocation8 + $0x54] sm:$0xf] }
  0x76   :  { %1019 = vmatpush.bf16.msra.mxu2 %v1902_v57  ;;  %v2476_v57 = vld [vmem:[#allocation5 + $0x24c] sm:$0xf]  ;;  %v1647_v16 = vld [vmem:[#allocation5 + $0x18] sm:$0xf0]  ;;  %v2050_v19 = vor.u32 %v2504_v10, %v2047_v11  ;;  %v2191_v10 = vld [vmem:[#allocation8 + $0x58] sm:$0xf0] }
  0x77   :  { %1033 = vmatpush.bf16.msra.mxu3 %v2030_v62  ;;  %992 = vmatmul.bf16.vlgmr.msra.gmra.mxu0 %v2792_v59  ;;  %v2063_v62 = vld [vmem:[#allocation5 + $0x358] sm:$0xf0]  ;;  %v2436_v17 = vld [vmem:[#allocation5 + $0x10c] sm:$0xf]  ;;  %v2229_v11 = vld [vmem:[#allocation8 + $0xa0] sm:$0xf] }
  0x78   :  { %1040 = vmatpush.bf16.msrb.mxu0 %v1762_v63  ;;  %1006 = vmatmul.bf16.vlgmr.msra.gmra.mxu1 %v2796_v0  ;;  %v1682_v63 = vor.u32 %v2412_v51, %v1679_v52  ;;  %v2468_v20 = vld [vmem:[#allocation5 + $0x20c] sm:$0xf]  ;;  %v1903_v21 = vld [vmem:[#allocation5 + $0x218] sm:$0xf0]  ;;  %v2149_v51 = vld [vmem:[#allocation8] sm:$0xf] }
  0x79   :  { %1054 = vmatpush.bf16.msrb.mxu1 %v1890_v1  ;;  %1020 = vmatmul.bf16.vlgmr.msra.gmra.mxu2 %v2790_v55  ;;  %v1810_v1 = vor.u32 %v2444_v53, %v1807_v56  ;;  %v2500_v22 = vld [vmem:[#allocation5 + $0x30c] sm:$0xf]  ;;  %v2031_v23 = vld [vmem:[#allocation5 + $0x318] sm:$0xf0]  ;;  %v1906_v28 = vor.u32 %v2468_v20, %v1903_v21  ;;  %v2545_v53 = vld [vmem:[#allocation8 + $0x74] sm:$0xf] }
  0x7a   :  { %1068 = vmatpush.bf16.msrb.mxu2 %v2018_v2  ;;  %1034 = vmatmul.bf16.vlgmr.msra.gmra.mxu3 %v2794_v60  ;;  %v1938_v2 = vor.u32 %v2476_v57, %v1935_v58  ;;  %v2034_v29 = vor.u32 %v2500_v22, %v2031_v23  ;;  %v2544_v32 = vld [vmem:[#allocation8 + $0x64] sm:$0xf0]  ;;  %v2542_v35 = vld [vmem:[#allocation8 + $0x54] sm:$0xf0]  ;;  %v2253_v56 = vld [vmem:[#allocation8 + $0xd0] sm:$0xf] }
  0x7b   :  { %1082 = vmatpush.bf16.msrb.mxu3 %v2146_v6  ;;  %v2066_v6 = vor.u32 %v2508_v61, %v2063_v62  ;;  %v2198_v33 = vor.u32 %v2544_v32, %v2197_v31  ;;  %v2538_v41 = vld [vmem:[#allocation8 + $0x34] sm:$0xf0]  ;;  %v2532_v52 = vld [vmem:[#allocation8 + $0x4] sm:$0xf0]  ;;  %v2221_v20 = vld [vmem:[#allocation8 + $0x90] sm:$0xf] }
  0x7c   :  { %1041 = vmatpush.bf16.msrb.mxu0 %v1746_v12  ;;  %v1666_v12 = vor.u32 %v2408_v3, %v1663_v4  ;;  %v2562_v45 = vld [vmem:[#allocation8 + $0xf4] sm:$0xf0]  ;;  %v2150_v61 = vor.u32 %v2532_v52, %v2149_v51  ;;  %v2556_v3 = vld [vmem:[#allocation8 + $0xc4] sm:$0xf0]  ;;  %v2537_v23 = vld [vmem:[#allocation8 + $0x34] sm:$0xf] }
  0x7d   :  { %1055 = vmatpush.bf16.msrb.mxu1 %v1874_v13  ;;  %v2404_v13 = vld [vmem:[#allocation5 + $0xc] sm:$0xf]  ;;  %v2270_v46 = vor.u32 %v2562_v45, %v2269_v44  ;;  %v2534_v47 = vld [vmem:[#allocation8 + $0x14] sm:$0xf0]  ;;  %v2167_v31 = vld [vmem:[#allocation8 + $0x28] sm:$0xf0] }
  0x7e   :  { %1069 = vmatpush.bf16.msrb.mxu2 %v2002_v14  ;;  %v1794_v14 = vor.u32 %v2440_v5, %v1791_v7  ;;  %v2558_v57 = vld [vmem:[#allocation8 + $0xd4] sm:$0xf0]  ;;  %v2237_v5 = vld [vmem:[#allocation8 + $0xb0] sm:$0xf]  ;;  %v2213_v32 = vld [vmem:[#allocation8 + $0x80] sm:$0xf] }
  0x7f   :  { %1083 = vmatpush.bf16.msrb.mxu3 %v2130_v18  ;;  %v1775_v18 = vld [vmem:[#allocation5 + $0x118] sm:$0xf0]  ;;  %v2254_v58 = vor.u32 %v2558_v57, %v2253_v56  ;;  %v2533_v45 = vld [vmem:[#allocation8 + $0x14] sm:$0xf]  ;;  %v2531_v56 = vld [vmem:[#allocation8 + $0x4] sm:$0xf] }
  0x80   :  { %1042 = vmatpush.bf16.msrb.mxu0 %v1730_v24  ;;  %v2205_v24 = vld [vmem:[#allocation8 + $0x70] sm:$0xf]  ;;  %v1778_v27 = vor.u32 %v2436_v17, %v1775_v18  ;;  %v2183_v17 = vld [vmem:[#allocation8 + $0x48] sm:$0xf0]  ;;  %v2550_v21 = vld [vmem:[#allocation8 + $0x94] sm:$0xf0] }
  0x81   :  { %1056 = vmatpush.bf16.msrb.mxu1 %v1858_v25  ;;  %v2546_v25 = vld [vmem:[#allocation8 + $0x74] sm:$0xf0]  ;;  %v2151_v57 = vld [vmem:[#allocation8 + $0x8] sm:$0xf0] }
  0x82   :  { %1070 = vmatpush.bf16.msrb.mxu2 %v1986_v26  ;;  %v1650_v26 = vor.u32 %v2404_v13, %v1647_v16  ;;  %v2814_v13 = vld [vmem:[#allocation7] sm:$0xf]  ;;  %v2539_v16 = vld [vmem:[#allocation8 + $0x44] sm:$0xf] }
  0x83   :  { %1084 = vmatpush.bf16.msrb.mxu3 %v2114_v30  ;;  %v2206_v30 = vor.u32 %v2546_v25, %v2205_v24  ;;  %v224_v18 = vperm.slane %v2814_v13, 0  ;;  %v2175_v24 = vld [vmem:[#allocation8 + $0x38] sm:$0xf0]  ;;  %v2222_v25 = vor.u32 %v2550_v21, %v2221_v20  ;;  %v2553_v20 = vld [vmem:[#allocation8 + $0xb4] sm:$0xf] }
  0x84   :  { %1043 = vmatpush.bf16.msrb.mxu0 %v1714_v36  ;;  %v2190_v36 = vor.u32 %v2542_v35, %v2189_v34 }
  0x85   :  { %1057 = vmatpush.bf16.msrb.mxu1 %v1842_v37  ;;  %v2181_v37 = vld [vmem:[#allocation8 + $0x40] sm:$0xf] }
  0x86   :  { %1071 = vmatpush.bf16.msrb.mxu2 %v1970_v38  ;;  %v2540_v38 = vld [vmem:[#allocation8 + $0x44] sm:$0xf0] }
  0x87   :  { %1085 = vmatpush.bf16.msrb.mxu3 %v2098_v42  ;;  %v2182_v39 = vor.u32 %v2540_v38, %v2181_v37  ;;  %v2174_v42 = vor.u32 %v2538_v41, %v2173_v40  ;;  %v2578_v37 = vld [vmem:[#allocation8 + $0x174] sm:$0xf0]  ;;  %v2561_v40 = vld [vmem:[#allocation8 + $0xf4] sm:$0xf]  ;;  %v2271_v41 = vld [vmem:[#allocation8 + $0xf8] sm:$0xf0] }
  0x88   :  { %1044 = vmatpush.bf16.msrb.mxu0 %v1698_v48  ;;  %v2560_v48 = vld [vmem:[#allocation8 + $0xe4] sm:$0xf0] }
  0x89   :  { %1058 = vmatpush.bf16.msrb.mxu1 %v1826_v49 }
  0x8a   :  { %1072 = vmatpush.bf16.msrb.mxu2 %v1954_v50 }
  0x8b   :  { %1086 = vmatpush.bf16.msrb.mxu3 %v2082_v54  ;;  %v2207_v54 = vld [vmem:[#allocation8 + $0x78] sm:$0xf0] }
  0x8c   :  { %1045 = vmatpush.bf16.msrb.mxu0 %v1682_v63  ;;  %v2210_v62 = vor.u32 %v2545_v53, %v2207_v54  ;;  %v2543_v63 = vld [vmem:[#allocation8 + $0x64] sm:$0xf] }
  0x8d   :  { %1059 = vmatpush.bf16.msrb.mxu1 %v1810_v1  ;;  %v2199_v1 = vld [vmem:[#allocation8 + $0x68] sm:$0xf0] }
  0x8e   :  { %1073 = vmatpush.bf16.msrb.mxu2 %v1938_v2  ;;  %v2245_v2 = vld [vmem:[#allocation8 + $0xc0] sm:$0xf]  ;;  %v2202_v7 = vor.u32 %v2543_v63, %v2199_v1  ;;  %v2557_v63 = vld [vmem:[#allocation8 + $0xd4] sm:$0xf] }
  0x8f   :  { %1087 = vmatpush.bf16.msrb.mxu3 %v2066_v6  ;;  %v2246_v4 = vor.u32 %v2556_v3, %v2245_v2  ;;  %v2554_v6 = vld [vmem:[#allocation8 + $0xb4] sm:$0xf0] }
  0x90   :  { %1046 = vmatpush.bf16.msrb.mxu0 %v1666_v12  ;;  %v2238_v9 = vor.u32 %v2554_v6, %v2237_v5  ;;  %v2552_v12 = vld [vmem:[#allocation8 + $0xa4] sm:$0xf0]  ;;  %v2154_v5 = vor.u32 %v2531_v56, %v2151_v57  ;;  %v2575_v56 = vld [vmem:[#allocation8 + $0x164] sm:$0xf] }
  0x91   :  { %1060 = vmatpush.bf16.msrb.mxu1 %v1794_v14  ;;  %v2194_v14 = vor.u32 %v2541_v8, %v2191_v10  ;;  %v2572_v10 = vld [vmem:[#allocation8 + $0x144] sm:$0xf0] }
  0x92   :  { %1074 = vmatpush.bf16.msrb.mxu2 %v1922_v15  ;;  %v2230_v15 = vor.u32 %v2552_v12, %v2229_v11  ;;  %v2555_v11 = vld [vmem:[#allocation8 + $0xc4] sm:$0xf] }
  0x93   :  { %1088 = vmatpush.bf16.msrb.mxu3 %v2050_v19  ;;  %v2186_v19 = vor.u32 %v2539_v16, %v2183_v17 }
  0x94   :  { %1047 = vmatpush.bf16.msrb.mxu0 %v1650_v26 }
  0x95   :  { %1061 = vmatpush.bf16.msrb.mxu1 %v1778_v27 }
  0x96   :  { %1075 = vmatpush.bf16.msrb.mxu2 %v1906_v28  ;;  %v2178_v28 = vor.u32 %v2537_v23, %v2175_v24  ;;  %v2293_v23 = vld [vmem:[#allocation8 + $0x120] sm:$0xf]  ;;  %v2568_v24 = vld [vmem:[#allocation8 + $0x124] sm:$0xf0] }
  0x97   :  { %1089 = vmatpush.bf16.msrb.mxu3 %v2034_v29  ;;  %1048 = vmatmul.bf16.vlgmr.msrb.gmra.mxu0 %v2792_v59  ;;  %v2536_v59 = vld [vmem:[#allocation8 + $0x24] sm:$0xf0]  ;;  %v2535_v29 = vld [vmem:[#allocation8 + $0x24] sm:$0xf] }
  0x98   :  { %1498 = vmatpush.bf16.msra.mxu0 %v2206_v30  ;;  %1062 = vmatmul.bf16.vlgmr.msrb.gmra.mxu1 %v2796_v0  ;;  %v2166_v0 = vor.u32 %v2536_v59, %v2165_v43  ;;  %v2274_v43 = vor.u32 %v2561_v40, %v2271_v41  ;;  %v2277_v41 = vld [vmem:[#allocation8 + $0x100] sm:$0xf] }
  0x99   :  { %1076 = vmatmul.bf16.vlgmr.msrb.gmra.mxu2 %v2790_v55  ;;  %v2157_v55 = vld [vmem:[#allocation8 + $0x10] sm:$0xf]  ;;  %1512 = vmatpush.bf16.msra.mxu1 %v2270_v46  ;;  %v2159_v46 = vld [vmem:[#allocation8 + $0x18] sm:$0xf0] }
  0x9a   :  { %1090 = vmatmul.bf16.vlgmr.msrb.gmra.mxu3 %v2794_v60  ;;  %v2261_v60 = vld [vmem:[#allocation8 + $0xe0] sm:$0xf]  ;;  %v2158_v50 = vor.u32 %v2534_v47, %v2157_v55  ;;  %v2162_v52 = vor.u32 %v2533_v45, %v2159_v46  ;;  %v2397_v45 = vld [vmem:[#allocation8 + $0x1f0] sm:$0xf]  ;;  %v2594_v46 = vld [vmem:[#allocation8 + $0x1f4] sm:$0xf0] }
  0x9b   :  { %v2262_v49 = vor.u32 %v2560_v48, %v2261_v60  ;;  %v2325_v47 = vld [vmem:[#allocation8 + $0x160] sm:$0xf]  ;;  %v2576_v60 = vld [vmem:[#allocation8 + $0x164] sm:$0xf0]  ;;  %v2559_v48 = vld [vmem:[#allocation8 + $0xe4] sm:$0xf] }
  0x9c   :  { %1499 = vmatpush.bf16.msra.mxu0 %v2198_v33  ;;  %v2548_v33 = vld [vmem:[#allocation8 + $0x84] sm:$0xf0] }
  0x9d   :  { %1513 = vmatpush.bf16.msra.mxu1 %v2262_v49  ;;  %v2214_v35 = vor.u32 %v2548_v33, %v2213_v32  ;;  %v2326_v49 = vor.u32 %v2576_v60, %v2325_v47  ;;  %v2566_v32 = vld [vmem:[#allocation8 + $0x114] sm:$0xf0]  ;;  %v2549_v33 = vld [vmem:[#allocation8 + $0x94] sm:$0xf]  ;;  %v2398_v47 = vor.u32 %v2594_v46, %v2397_v45  ;;  %v2580_v45 = vld [vmem:[#allocation8 + $0x184] sm:$0xf0] }
  0x9e   :  { %v2577_v60 = vld [vmem:[#allocation8 + $0x174] sm:$0xf]  ;;  %v2563_v46 = vld [vmem:[#allocation8 + $0x104] sm:$0xf] }
  0x9f   :  { %1540 = vmatpush.bf16.msra.mxu3 %v2398_v47  ;;  %v2593_v47 = vld [vmem:[#allocation8 + $0x1f4] sm:$0xf] }
  0xa0   :  { %1500 = vmatpush.bf16.msra.mxu0 %v2190_v36  ;;  %v2333_v36 = vld [vmem:[#allocation8 + $0x170] sm:$0xf] }
  0xa1   :  { %1514 = vmatpush.bf16.msra.mxu1 %v2254_v58 }
  0xa4   :  { %1501 = vmatpush.bf16.msra.mxu0 %v2182_v39  ;;  %v2334_v39 = vor.u32 %v2578_v37, %v2333_v36  ;;  %v2223_v36 = vld [vmem:[#allocation8 + $0x98] sm:$0xf0] }
  0xa5   :  { %1515 = vmatpush.bf16.msra.mxu1 %v2246_v4  ;;  %v2255_v4 = vld [vmem:[#allocation8 + $0xd8] sm:$0xf0] }
  0xa6   :  { %1526 = vmatpush.bf16.msra.mxu2 %v2334_v39  ;;  %v2258_v6 = vor.u32 %v2557_v63, %v2255_v4  ;;  %v2226_v39 = vor.u32 %v2549_v33, %v2223_v36  ;;  %v2590_v4 = vld [vmem:[#allocation8 + $0x1d4] sm:$0xf0]  ;;  %v2349_v36 = vld [vmem:[#allocation8 + $0x190] sm:$0xf] }
  0xa8   :  { %1502 = vmatpush.bf16.msra.mxu0 %v2174_v42  ;;  %v2170_v42 = vor.u32 %v2535_v29, %v2167_v31  ;;  %v2285_v31 = vld [vmem:[#allocation8 + $0x110] sm:$0xf] }
  0xa9   :  { %1516 = vmatpush.bf16.msra.mxu1 %v2238_v9  ;;  %v2309_v9 = vld [vmem:[#allocation8 + $0x140] sm:$0xf] }
  0xaa   :  { %1527 = vmatpush.bf16.msra.mxu2 %v2326_v49 }
  0xac   :  { %1503 = vmatpush.bf16.msra.mxu0 %v2166_v0 }
  0xad   :  { %1517 = vmatpush.bf16.msra.mxu1 %v2230_v15  ;;  %v2247_v15 = vld [vmem:[#allocation8 + $0xc8] sm:$0xf0] }
  0xae   :  { %v2250_v16 = vor.u32 %v2555_v11, %v2247_v15  ;;  %v2373_v15 = vld [vmem:[#allocation8 + $0x1c0] sm:$0xf] }
  0xb0   :  { %1504 = vmatpush.bf16.msra.mxu0 %v2158_v50  ;;  %v2263_v50 = vld [vmem:[#allocation8 + $0xe8] sm:$0xf0] }
  0xb1   :  { %1518 = vmatpush.bf16.msra.mxu1 %v2222_v25  ;;  %v2266_v53 = vor.u32 %v2559_v48, %v2263_v50  ;;  %v2335_v48 = vld [vmem:[#allocation8 + $0x178] sm:$0xf0] }
  0xb2   :  { %v2338_v50 = vor.u32 %v2577_v60, %v2335_v48  ;;  %v2399_v60 = vld [vmem:[#allocation8 + $0x1f8] sm:$0xf0] }
  0xb4   :  { %1505 = vmatpush.bf16.msra.mxu0 %v2150_v61  ;;  %v2317_v61 = vld [vmem:[#allocation8 + $0x150] sm:$0xf] }
  0xb5   :  { %v895_v27 = vpop.f32.mrf.mxu1  ;;  %1519 = vmatpush.bf16.msra.mxu1 %v2214_v35  ;;  %v2286_v35 = vor.u32 %v2566_v32, %v2285_v31  ;;  %v2567_v31 = vld [vmem:[#allocation8 + $0x124] sm:$0xf]  ;;  %v2295_v32 = vld [vmem:[#allocation8 + $0x128] sm:$0xf0] }
  0xb7   :  { %v881_v22 = vpop.f32.mrf.mxu0 }
  0xb8   :  { %1554 = vmatpush.bf16.msrb.mxu0 %v2210_v62  ;;  %v882_v26 = vadd.f32 %v881_v22, %v224_v18  ;;  %v2574_v62 = vld [vmem:[#allocation8 + $0x154] sm:$0xf0]  ;;  %v2239_v22 = vld [vmem:[#allocation8 + $0xb8] sm:$0xf0] }
  0xb9   :  { %1568 = vmatpush.bf16.msrb.mxu1 %v2274_v43  ;;  %v2318_v3 = vor.u32 %v2574_v62, %v2317_v61  ;;  %v2242_v25 = vor.u32 %v2553_v20, %v2239_v22  ;;  %v2547_v43 = vld [vmem:[#allocation8 + $0x84] sm:$0xf]  ;;  %v2327_v62 = vld [vmem:[#allocation8 + $0x168] sm:$0xf0] }
  0xba   :  { %v896_v30 = vadd.f32 %v895_v27, %v882_v26  ;;  %v2551_v26 = vld [vmem:[#allocation8 + $0xa4] sm:$0xf]  ;;  %v2231_v27 = vld [vmem:[#allocation8 + $0xa8] sm:$0xf0]  ;;  %v2330_v63 = vor.u32 %v2575_v56, %v2327_v62 }
  0xbb   :  { %1528 = vmatpush.bf16.msra.mxu2 %v2318_v3  ;;  %v2234_v29 = vor.u32 %v2551_v26, %v2231_v27  ;;  %v2381_v3 = vld [vmem:[#allocation8 + $0x1d0] sm:$0xf]  ;;  %v2303_v27 = vld [vmem:[#allocation8 + $0x138] sm:$0xf0] }
  0xbc   :  { %1555 = vmatpush.bf16.msrb.mxu0 %v2202_v7  ;;  %v909_v34 = vpop.f32.mrf.mxu2 }
  0xbd   :  { %v910_v59 = vadd.f32 %v909_v34, %v896_v30  ;;  %v897_v55 = vpop.f32.mrf.mxu1  ;;  %1569 = vmatpush.bf16.msrb.mxu1 %v2266_v53  ;;  %v225_v30 = vperm.slane %v2814_v13, 1  ;;  %v2389_v53 = vld [vmem:[#allocation8 + $0x1e0] sm:$0xf] }
  0xbf   :  { %v923_v38 = vpop.f32.mrf.mxu3  ;;  %v883_v44 = vpop.f32.mrf.mxu0 }
  0xc0   :  { %1556 = vmatpush.bf16.msrb.mxu0 %v2194_v14  ;;  %v884_v0 = vadd.f32 %v883_v44, %v224_v18  ;;  %v924_v54 = vadd.f32 %v923_v38, %v910_v59  ;;  %v2310_v14 = vor.u32 %v2572_v10, %v2309_v9  ;;  %v2301_v18 = vld [vmem:[#allocation8 + $0x130] sm:$0xf]  ;;  %v2215_v44 = vld [vmem:[#allocation8 + $0x88] sm:$0xf0] }
  0xc1   :  { %1570 = vmatpush.bf16.msrb.mxu1 %v2258_v6 }
  0xc2   :  { %v898_v51 = vadd.f32 %v897_v55, %v884_v0  ;;  %v1096_v7 = vmax.f32 %v924_v54, 0.0  ;;  %1529 = vmatpush.bf16.msra.mxu2 %v2310_v14  ;;  %v2218_v55 = vor.u32 %v2547_v43, %v2215_v44  ;;  %v2592_v54 = vld [vmem:[#allocation8 + $0x1e4] sm:$0xf0]  ;;  %v2341_v44 = vld [vmem:[#allocation8 + $0x180] sm:$0xf] }
  0xc3   :  { %v2390_v61 = vor.u32 %v2592_v54, %v2389_v53  ;;  %v2591_v53 = vld [vmem:[#allocation8 + $0x1e4] sm:$0xf]  ;;  %v2391_v54 = vld [vmem:[#allocation8 + $0x1e8] sm:$0xf0] }
  0xc4   :  { %1557 = vmatpush.bf16.msrb.mxu0 %v2186_v19  ;;  %v911_v58 = vpop.f32.mrf.mxu2  ;;  %v2570_v19 = vld [vmem:[#allocation8 + $0x134] sm:$0xf0] }
  0xc5   :  { %v912_v1 = vadd.f32 %v911_v58, %v898_v51  ;;  %1571 = vmatpush.bf16.msrb.mxu1 %v2250_v16  ;;  %v2302_v21 = vor.u32 %v2570_v19, %v2301_v18  ;;  %1541 = vmatpush.bf16.msra.mxu3 %v2390_v61  ;;  %v2588_v16 = vld [vmem:[#allocation8 + $0x1c4] sm:$0xf0]  ;;  %v2311_v19 = vld [vmem:[#allocation8 + $0x148] sm:$0xf0] }
  0xc6   :  { %v2374_v18 = vor.u32 %v2588_v16, %v2373_v15  ;;  %v2585_v15 = vld [vmem:[#allocation8 + $0x1b4] sm:$0xf]  ;;  %v2367_v16 = vld [vmem:[#allocation8 + $0x1b8] sm:$0xf0] }
  0xc7   :  { %v925_v2 = vpop.f32.mrf.mxu3  ;;  %1530 = vmatpush.bf16.msra.mxu2 %v2302_v21 }
  0xc8   :  { %1558 = vmatpush.bf16.msrb.mxu0 %v2178_v28  ;;  %v926_v8 = vadd.f32 %v925_v2, %v912_v1  ;;  %v2294_v28 = vor.u32 %v2568_v24, %v2293_v23  ;;  %v2365_v23 = vld [vmem:[#allocation8 + $0x1b0] sm:$0xf]  ;;  %v2586_v24 = vld [vmem:[#allocation8 + $0x1b4] sm:$0xf0] }
  0xc9   :  { %1572 = vmatpush.bf16.msrb.mxu1 %v2242_v25  ;;  %v2569_v25 = vld [vmem:[#allocation8 + $0x134] sm:$0xf]  ;;  %v2366_v26 = vor.u32 %v2586_v24, %v2365_v23  ;;  %v2351_v23 = vld [vmem:[#allocation8 + $0x198] sm:$0xf0] }
  0xca   :  { %v1100_v12 = vmax.f32 %v926_v8, 0.0  ;;  %v2319_v8 = vld [vmem:[#allocation8 + $0x158] sm:$0xf0] }
  0xcb   :  { %1531 = vmatpush.bf16.msra.mxu2 %v2294_v28  ;;  %v2357_v28 = vld [vmem:[#allocation8 + $0x1a0] sm:$0xf] }
  0xcc   :  { %1559 = vmatpush.bf16.msrb.mxu0 %v2170_v42  ;;  %v1104_v17 = vpack.c.bf16 %v1100_v12, %v1096_v7  ;;  %v2564_v42 = vld [vmem:[#allocation8 + $0x104] sm:$0xf0]  ;;  %v2382_v7 = vor.u32 %v2590_v4, %v2381_v3 }
  0xcd   :  { %1573 = vmatpush.bf16.msrb.mxu1 %v2234_v29  ;;  %v2278_v59 = vor.u32 %v2564_v42, %v2277_v41  ;;  %v2584_v29 = vld [vmem:[#allocation8 + $0x1a4] sm:$0xf0] }
  0xce   :  { %1506 = vmatmul.bf16.vlgmr.msra.gmra.mxu0 %v1104_v17  ;;  %1542 = vmatpush.bf16.msra.mxu3 %v2382_v7  ;;  %v2358_v33 = vor.u32 %v2584_v29, %v2357_v28 }
  0xcf   :  { %1532 = vmatpush.bf16.msra.mxu2 %v2286_v35  ;;  %v226_v35 = vperm.slane %v2814_v13, 2 }
  0xd0   :  { %1560 = vmatpush.bf16.msrb.mxu0 %v2162_v52 }
  0xd1   :  { %1574 = vmatpush.bf16.msrb.mxu1 %v2226_v39 }
  0xd2   :  { %1543 = vmatpush.bf16.msra.mxu3 %v2374_v18  ;;  %v2370_v18 = vor.u32 %v2585_v15, %v2367_v16 }
  0xd3   :  { %1533 = vmatpush.bf16.msra.mxu2 %v2278_v59 }
  0xd4   :  { %1561 = vmatpush.bf16.msrb.mxu0 %v2154_v5  ;;  %v937_v34 = vpop.f32.mrf.mxu0  ;;  %v2573_v5 = vld [vmem:[#allocation8 + $0x154] sm:$0xf] }
  0xd5   :  { %v938_v37 = vadd.f32 %v937_v34, %v225_v30  ;;  %v951_v38 = vpop.f32.mrf.mxu1  ;;  %1575 = vmatpush.bf16.msrb.mxu1 %v2218_v55  ;;  %v2322_v11 = vor.u32 %v2573_v5, %v2319_v8  ;;  %v2298_v34 = vor.u32 %v2567_v31, %v2295_v32  ;;  %v2279_v55 = vld [vmem:[#allocation8 + $0x108] sm:$0xf0]  ;;  %v2587_v8 = vld [vmem:[#allocation8 + $0x1c4] sm:$0xf] }
  0xd6   :  { %1544 = vmatpush.bf16.msra.mxu3 %v2366_v26  ;;  %v2343_v26 = vld [vmem:[#allocation8 + $0x188] sm:$0xf0] }
  0xd7   :  { %v952_v40 = vadd.f32 %v951_v38, %v938_v37  ;;  %1582 = vmatpush.bf16.msrb.mxu2 %v2338_v50  ;;  %v2582_v37 = vld [vmem:[#allocation8 + $0x194] sm:$0xf0]  ;;  %v2565_v38 = vld [vmem:[#allocation8 + $0x114] sm:$0xf]  ;;  %v2402_v50 = vor.u32 %v2593_v47, %v2399_v60 }
  0xd8   :  { %v2350_v39 = vor.u32 %v2582_v37, %v2349_v36 }
  0xda   :  { %1545 = vmatpush.bf16.msra.mxu3 %v2358_v33 }
  0xdb   :  { %1583 = vmatpush.bf16.msrb.mxu2 %v2330_v63 }
  0xdc   :  { %v965_v0 = vpop.f32.mrf.mxu2  ;;  %v939_v52 = vpop.f32.mrf.mxu0 }
  0xdd   :  { %v979_v49 = vpop.f32.mrf.mxu3  ;;  %v966_v51 = vadd.f32 %v965_v0, %v952_v40  ;;  %v940_v57 = vadd.f32 %v939_v52, %v225_v30  ;;  %v953_v58 = vpop.f32.mrf.mxu1  ;;  %v2306_v30 = vor.u32 %v2569_v25, %v2303_v27  ;;  %v2287_v40 = vld [vmem:[#allocation8 + $0x118] sm:$0xf0]  ;;  %v2342_v0 = vor.u32 %v2580_v45, %v2341_v44  ;;  %v2579_v25 = vld [vmem:[#allocation8 + $0x184] sm:$0xf] }
  0xde   :  { %1562 = vmatmul.bf16.vlgmr.msrb.gmra.mxu0 %v1104_v17  ;;  %v2571_v17 = vld [vmem:[#allocation8 + $0x144] sm:$0xf]  ;;  %v2290_v42 = vor.u32 %v2565_v38, %v2287_v40  ;;  %1546 = vmatpush.bf16.msra.mxu3 %v2350_v39  ;;  %v227_v27 = vperm.slane %v2814_v13, 3  ;;  %v2346_v29 = vor.u32 %v2579_v25, %v2343_v26 }
  0xdf   :  { %v980_v1 = vadd.f32 %v979_v49, %v966_v51  ;;  %v954_v2 = vadd.f32 %v953_v58, %v940_v57  ;;  %1584 = vmatpush.bf16.msrb.mxu2 %v2322_v11  ;;  %v2314_v21 = vor.u32 %v2571_v17, %v2311_v19  ;;  %v2282_v49 = vor.u32 %v2563_v46, %v2279_v55  ;;  %v2583_v19 = vld [vmem:[#allocation8 + $0x1a4] sm:$0xf] }
  0xe0   :  { %v2394_v58 = vor.u32 %v2591_v53, %v2391_v54 }
  0xe1   :  { %v1097_v12 = vmax.f32 %v980_v1, 0.0  ;;  %v2589_v1 = vld [vmem:[#allocation8 + $0x1d4] sm:$0xf] }
  0xe2   :  { %1547 = vmatpush.bf16.msra.mxu3 %v2342_v0  ;;  %v1172_v0 = vld [vmem:[%s2833_s4] sm:$0x3]  ;;  %s2744_s4 = smov [#allocation10]  }
  0xe3   :  { %1585 = vmatpush.bf16.msrb.mxu2 %v2314_v21  ;;  %v1174_v60 = vperm.slane %v1172_v0, 0  ;;  %s1618_s17 = sshll.u32 %s2744_s4, 4  ;;  %s1619_s17 = int_to_ptr.vmem [resolvable:$true] %s1618_s17 }
  0xe4   :  { %v967_v6 = vpop.f32.mrf.mxu2 }
  0xe5   :  { %v968_v9 = vadd.f32 %v967_v6, %v954_v2  ;;  %v981_v10 = vpop.f32.mrf.mxu3  ;;  %v2383_v2 = vld [vmem:[#allocation8 + $0x1d8] sm:$0xf0] }
  0xe6   :  { %1596 = vmatpush.bf16.msrb.mxu3 %v2402_v50  ;;  %v2386_v4 = vor.u32 %v2589_v1, %v2383_v2 }
  0xe7   :  { %v982_v14 = vadd.f32 %v981_v10, %v968_v9  ;;  %1586 = vmatpush.bf16.msrb.mxu2 %v2306_v30  ;;  %v2375_v9 = vld [vmem:[#allocation8 + $0x1c8] sm:$0xf0] }
  0xe9   :  { %v1101_v20 = vmax.f32 %v982_v14, 0.0 }
  0xea   :  { %1597 = vmatpush.bf16.msrb.mxu3 %v2394_v58 }
  0xeb   :  { %v1105_v22 = vpack.c.bf16 %v1101_v20, %v1097_v12  ;;  %1587 = vmatpush.bf16.msrb.mxu2 %v2298_v34  ;;  %v2378_v12 = vor.u32 %v2587_v8, %v2375_v9  ;;  %v2359_v20 = vld [vmem:[#allocation8 + $0x1a8] sm:$0xf0] }
  0xec   :  { %v2362_v21 = vor.u32 %v2583_v19, %v2359_v20 }
  0xed   :  { %1520 = vmatmul.bf16.vlgmr.msra.gmra.mxu1 %v1105_v22 }
  0xee   :  { %1598 = vmatpush.bf16.msrb.mxu3 %v2386_v4 }
  0xef   :  { %1588 = vmatpush.bf16.msrb.mxu2 %v2290_v42 }
  0xf2   :  { %1599 = vmatpush.bf16.msrb.mxu3 %v2378_v12 }
  0xf3   :  { %1589 = vmatpush.bf16.msrb.mxu2 %v2282_v49 }
  0xf4   :  { %v993_v41 = vpop.f32.mrf.mxu0 }
  0xf5   :  { %v994_v43 = vadd.f32 %v993_v41, %v226_v35  ;;  %v1007_v59 = vpop.f32.mrf.mxu1 }
  0xf6   :  { %1600 = vmatpush.bf16.msrb.mxu3 %v2370_v18 }
  0xf7   :  { %v1008_v48 = vadd.f32 %v1007_v59, %v994_v43 }
  0xfa   :  { %1601 = vmatpush.bf16.msrb.mxu3 %v2362_v21 }
  0xfc   :  { %v1021_v51 = vpop.f32.mrf.mxu2  ;;  %v995_v57 = vpop.f32.mrf.mxu0 }
  0xfd   :  { %v1035_v52 = vpop.f32.mrf.mxu3  ;;  %v1022_v56 = vadd.f32 %v1021_v51, %v1008_v48  ;;  %1576 = vmatmul.bf16.vlgmr.msrb.gmra.mxu1 %v1105_v22  ;;  %v996_v61 = vadd.f32 %v995_v57, %v226_v35  ;;  %v1009_v62 = vpop.f32.mrf.mxu1  ;;  %v2581_v22 = vld [vmem:[#allocation8 + $0x194] sm:$0xf] }
  0xfe   :  { %v2354_v24 = vor.u32 %v2581_v22, %v2351_v23 }
  0xff   :  { %v1010_v63 = vadd.f32 %v1009_v62, %v996_v61  ;;  %v1036_v3 = vadd.f32 %v1035_v52, %v1022_v56  ;;  %v1175_v62 = vperm.slane %v1172_v0, 1 }
 0x100   :  { %1602 = vmatpush.bf16.msrb.mxu3 %v2354_v24 }
 0x101   :  { %v1098_v10 = vmax.f32 %v1036_v3, 0.0 }
 0x104   :  { %v1023_v5 = vpop.f32.mrf.mxu2  ;;  %1603 = vmatpush.bf16.msrb.mxu3 %v2346_v29 }
 0x105   :  { %v1024_v6 = vadd.f32 %v1023_v5, %v1010_v63  ;;  %v1037_v7 = vpop.f32.mrf.mxu3 }
 0x107   :  { %v1038_v11 = vadd.f32 %v1037_v7, %v1024_v6 }
 0x109   :  { %v1102_v14 = vmax.f32 %v1038_v11, 0.0 }
 0x10b   :  { %v1106_v17 = vpack.c.bf16 %v1102_v14, %v1098_v10 }
 0x10d   :  { %1534 = vmatmul.bf16.vlgmr.msra.gmra.mxu2 %v1106_v17 }
 0x114   :  { %v1049_v28 = vpop.f32.mrf.mxu0 }
 0x115   :  { %v1063_v30 = vpop.f32.mrf.mxu1  ;;  %v1050_v31 = vadd.f32 %v1049_v28, %v227_v27 }
 0x117   :  { %v1064_v33 = vadd.f32 %v1063_v30, %v1050_v31 }
 0x11c   :  { %v1077_v32 = vpop.f32.mrf.mxu2  ;;  %v1051_v35 = vpop.f32.mrf.mxu0 }
 0x11d   :  { %v1091_v34 = vpop.f32.mrf.mxu3  ;;  %v1052_v36 = vadd.f32 %v1051_v35, %v227_v27  ;;  %1590 = vmatmul.bf16.vlgmr.msrb.gmra.mxu2 %v1106_v17  ;;  %v1078_v37 = vadd.f32 %v1077_v32, %v1064_v33  ;;  %v1065_v38 = vpop.f32.mrf.mxu1 }
 0x11f   :  { %v1066_v39 = vadd.f32 %v1065_v38, %v1052_v36  ;;  %v1092_v41 = vadd.f32 %v1091_v34, %v1078_v37 }
 0x121   :  { %v1099_v59 = vmax.f32 %v1092_v41, 0.0 }
 0x124   :  { %v1079_v40 = vpop.f32.mrf.mxu2 }
 0x125   :  { %v1080_v42 = vadd.f32 %v1079_v40, %v1066_v39  ;;  %v1093_v43 = vpop.f32.mrf.mxu3 }
 0x127   :  { %v1094_v13 = vadd.f32 %v1093_v43, %v1080_v42 }
 0x129   :  { %v1103_v44 = vmax.f32 %v1094_v13, 0.0 }
 0x12b   :  { %v1107_v45 = vpack.c.bf16 %v1103_v44, %v1099_v59 }
 0x12d   :  { %1548 = vmatmul.bf16.vlgmr.msra.gmra.mxu3 %v1107_v45 }
 0x13d   :  { %1604 = vmatmul.bf16.vlgmr.msrb.gmra.mxu3 %v1107_v45 }
 0x14b   :  { %v1507_v46 = vpop.f32.mrf.mxu0 }
 0x14c   :  { %v1508_v48 = vadd.f32 %v1507_v46, %v1174_v60 }
 0x153   :  { %v1509_v49 = vpop.f32.mrf.mxu0 }
 0x154   :  { %v1510_v57 = vadd.f32 %v1509_v49, %v1174_v60 }
 0x15b   :  { %v1563_v61 = vpop.f32.mrf.mxu0 }
 0x15c   :  { %v1564_v5 = vadd.f32 %v1563_v61, %v1175_v62 }
 0x163   :  { %v1565_v8 = vpop.f32.mrf.mxu0 }
 0x164   :  { %v1566_v12 = vadd.f32 %v1565_v8, %v1175_v62 }
 0x16a   :  { %v1521_v55 = vpop.f32.mrf.mxu1 }
 0x16b   :  { %v1522_v50 = vadd.f32 %v1521_v55, %v1508_v48 }
 0x172   :  { %v1523_v51 = vpop.f32.mrf.mxu1 }
 0x173   :  { %v1524_v58 = vadd.f32 %v1523_v51, %v1510_v57 }
 0x17a   :  { %v1577_v1 = vpop.f32.mrf.mxu1 }
 0x17b   :  { %v1578_v6 = vadd.f32 %v1577_v1, %v1564_v5 }
 0x182   :  { %v1579_v11 = vpop.f32.mrf.mxu1 }
 0x183   :  { %v1580_v15 = vadd.f32 %v1579_v11, %v1566_v12 }
 0x190   :  { %v1535_v47 = vpop.f32.mrf.mxu2 }
 0x191   :  { %v1536_v52 = vadd.f32 %v1535_v47, %v1522_v50 }
 0x198   :  { %v1537_v53 = vpop.f32.mrf.mxu2 }
 0x199   :  { %v1538_v63 = vadd.f32 %v1537_v53, %v1524_v58 }
 0x1a0   :  { %v1591_v4 = vpop.f32.mrf.mxu2 }
 0x1a1   :  { %v1592_v7 = vadd.f32 %v1591_v4, %v1578_v6 }
 0x1a8   :  { %v1593_v14 = vpop.f32.mrf.mxu2 }
 0x1a9   :  { %v1594_v16 = vadd.f32 %v1593_v14, %v1580_v15 }
 0x1b0   :  { %v1549_v54 = vpop.f32.mrf.mxu3 }
 0x1b1   :  { %v1550_v56 = vadd.f32 %v1549_v54, %v1536_v52 }
 0x1b3   :  { %1610 = vst [vmem:[#allocation10] sm:$0xff] %v1550_v56 }
 0x1b8   :  { %v1551_v2 = vpop.f32.mrf.mxu3 }
 0x1b9   :  { %v1552_v3 = vadd.f32 %v1551_v2, %v1538_v63 }
 0x1bb   :  { %1612 = vst [vmem:[#allocation10 + $0x10] sm:$0xff] %v1552_v3 }
 0x1c0   :  { %v1605_v9 = vpop.f32.mrf.mxu3 }
 0x1c1   :  { %v1606_v10 = vadd.f32 %v1605_v9, %v1592_v7 }
 0x1c3   :  { %1611 = vst [vmem:[#allocation10 + $0x8] sm:$0xff] %v1606_v10 }
 0x1c8   :  { %v1607_v17 = vpop.f32.mrf.mxu3 }
 0x1c9   :  { %v1608_v18 = vadd.f32 %v1607_v17, %v1594_v16 }
 0x1cb   :  { %1613 = vst [vmem:[#allocation10 + $0x18] sm:$0xff] %v1608_v18 }
 0x1cc   :  { %1626 = dma.vmem_to_hbm [thread:$0]  %s1619_s17, 512, %s1621_s20, [#allocation4], %s2735_s26, %s2735_s26, %s2736_s27  }
 0x1cd   :  { %2732 = dma.done.wait [#allocation4], 512  }
 0x1ce   :  { %2733 = vsyncadd [#allocation4], 4294966784 }
 0x1cf   :  { %1631 = vsyncpa [#allocation3], 1 }
 0x1d0   :  { %1632 = vsyncpa [#allocation6], 1 }
 0x1d1   :  { %1633 = vsyncpa [#allocation9], 1 }
 0x1d2   :  { %1634 = vsyncpa [#allocation4], 1 }

</bundles_post_ra>
